<compile_context>
chip_gen: v6e
topology: v6e:2x2x1
jax: 0.10.0
libtpu: 0.0.40
codegen_flags: <defaults>
</compile_context>

<pallas_src>
import jax
import jax.numpy as jnp
from jax import lax
from jax.experimental import pallas as pl
from jax.experimental.pallas import tpu as pltpu

# ---------------- scaled-down BERT config (bert-base-chinese shrunk) ---------
BATCH = 2
SEQ = 8
HIDDEN = 32
HEADS = 2
HEAD_DIM = HIDDEN // HEADS
INTER = 64
LAYERS = 2
VOCAB = 128
MAX_POS = 16
TYPE_VOCAB = 2
LN_EPS = 1e-12          # HF BERT layer_norm_eps


# ----------------------------- in-kernel helpers ------------------------------
def _gelu(x):
    # TODO(synk): HF BERT uses exact erf-GELU; tanh approximation used here
    # (numerically ~1e-3 close) since erf lowering on Mosaic is not guaranteed.
    c = 0.7978845608028654  # sqrt(2/pi)
    return 0.5 * x * (1.0 + jnp.tanh(c * (x + 0.044715 * x * x * x)))


def _layernorm(h, g, b):
    mu = jnp.mean(h, axis=-1, keepdims=True)
    var = jnp.mean((h - mu) * (h - mu), axis=-1, keepdims=True)
    return (h - mu) * lax.rsqrt(var + LN_EPS) * g + b


# ----------------------------- fused encoder kernel ---------------------------
def _encoder_kernel(emb_ref, mask_ref, eg_ref, eb_ref,
                    qkvw_ref, qkvb_ref, aow_ref, aob_ref, ln1g_ref, ln1b_ref,
                    iw_ref, ib_ref, ow_ref, ob_ref, ln2g_ref, ln2b_ref,
                    out_ref):
    # Embedding LayerNorm (no residual).
    h = _layernorm(emb_ref[...], eg_ref[...], eb_ref[...])        # (B*S, H)
    mask = mask_ref[...]                                          # (B, S) additive

    for l in range(LAYERS):                                       # static unroll
        # ---- fused QKV projection (scale pre-folded into Q slice) ----
        qkv = jnp.dot(h, qkvw_ref[l],
                      preferred_element_type=jnp.float32) + qkvb_ref[l]
        q = qkv[:, :HIDDEN]
        k = qkv[:, HIDDEN:2 * HIDDEN]
        v = qkv[:, 2 * HIDDEN:]

        # ---- self-attention, unrolled over (batch, head) ----
        ctx_rows = []
        for b in range(BATCH):
            m_b = mask[b:b + 1, :]                                # (1, S)
            r0, r1 = b * SEQ, (b + 1) * SEQ
            head_out = []
            for hh in range(HEADS):
                c0, c1 = hh * HEAD_DIM, (hh + 1) * HEAD_DIM
                qb = q[r0:r1, c0:c1]                              # (S, Dh)
                kb = k[r0:r1, c0:c1]
                vb = v[r0:r1, c0:c1]
                # q @ k^T without an explicit transpose: contract last dims.
                s = lax.dot_general(qb, kb, (((1,), (1,)), ((), ())),
                                    preferred_element_type=jnp.float32)
                s = s + m_b
                s = s - jnp.max(s, axis=-1, keepdims=True)
                p = jnp.exp(s)
                p = p * pl.reciprocal(jnp.sum(p, axis=-1, keepdims=True),
                                      approx=True)
                head_out.append(jnp.dot(p, vb,
                                        preferred_element_type=jnp.float32))
            ctx_rows.append(jnp.concatenate(head_out, axis=-1))   # (S, H)
        ctx = jnp.concatenate(ctx_rows, axis=0)                   # (B*S, H)

        # ---- attention output proj + add & LN ----
        ao = jnp.dot(ctx, aow_ref[l],
                     preferred_element_type=jnp.float32) + aob_ref[l]
        h = _layernorm(ao + h, ln1g_ref[l], ln1b_ref[l])

        # ---- GELU FFN + add & LN ----
        inter = _gelu(jnp.dot(h, iw_ref[l],
                              preferred_element_type=jnp.float32) + ib_ref[l])
        ffn = jnp.dot(inter, ow_ref[l],
                      preferred_element_type=jnp.float32) + ob_ref[l]
        h = _layernorm(ffn + h, ln2g_ref[l], ln2b_ref[l])

    out_ref[...] = h


# ----------------------------- params ------------------------------------------
def init_params(key):
    std = 0.02

    def nrm(k, shape):
        return std * jax.random.normal(k, shape, dtype=jnp.float32)

    keys = jax.random.split(key, 4 + LAYERS)
    p = {
        "word_emb": nrm(keys[0], (VOCAB, HIDDEN)),
        "pos_emb": nrm(keys[1], (MAX_POS, HIDDEN)),
        "type_emb": nrm(keys[2], (TYPE_VOCAB, HIDDEN)),
        "emb_ln_g": jnp.ones((1, HIDDEN), jnp.float32),
        "emb_ln_b": jnp.zeros((1, HIDDEN), jnp.float32),
    }

    scale = 1.0 / (HEAD_DIM ** 0.5)
    qkv_w, qkv_b = [], []
    ao_w, ao_b, ln1_g, ln1_b = [], [], [], []
    i_w, i_b, o_w, o_b, ln2_g, ln2_b = [], [], [], [], [], []
    for li in range(LAYERS):
        lk = jax.random.split(keys[4 + li], 8)
        q_w = nrm(lk[0], (HIDDEN, HIDDEN))
        k_w = nrm(lk[1], (HIDDEN, HIDDEN))
        v_w = nrm(lk[2], (HIDDEN, HIDDEN))
        zb = jnp.zeros((1, HIDDEN), jnp.float32)
        # Fused QKV weight/bias; attention scale folded into the Q slice.
        qkv_w.append(jnp.concatenate([q_w * scale, k_w, v_w], axis=1))
        qkv_b.append(jnp.concatenate([zb * scale, zb, zb], axis=1))
        ao_w.append(nrm(lk[3], (HIDDEN, HIDDEN)))
        ao_b.append(jnp.zeros((1, HIDDEN), jnp.float32))
        ln1_g.append(jnp.ones((1, HIDDEN), jnp.float32))
        ln1_b.append(jnp.zeros((1, HIDDEN), jnp.float32))
        i_w.append(nrm(lk[4], (HIDDEN, INTER)))
        i_b.append(jnp.zeros((1, INTER), jnp.float32))
        o_w.append(nrm(lk[5], (INTER, HIDDEN)))
        o_b.append(jnp.zeros((1, HIDDEN), jnp.float32))
        ln2_g.append(jnp.ones((1, HIDDEN), jnp.float32))
        ln2_b.append(jnp.zeros((1, HIDDEN), jnp.float32))

    p["stacked"] = {
        "qkv_w": jnp.stack(qkv_w), "qkv_b": jnp.stack(qkv_b),
        "ao_w": jnp.stack(ao_w), "ao_b": jnp.stack(ao_b),
        "ln1_g": jnp.stack(ln1_g), "ln1_b": jnp.stack(ln1_b),
        "i_w": jnp.stack(i_w), "i_b": jnp.stack(i_b),
        "o_w": jnp.stack(o_w), "o_b": jnp.stack(o_b),
        "ln2_g": jnp.stack(ln2_g), "ln2_b": jnp.stack(ln2_b),
    }
    return p


# ----------------------------- forward (JAX glue + one pallas_call) -----------
@jax.jit
def encoder_forward(params, sentence_tensor, sentence_mask):
    """Equivalent of Encoder.forward -> encoded_result[0] (last_hidden_state)."""
    B, S = sentence_tensor.shape

    # Embeddings (gather is JAX glue; everything else runs in the fused kernel).
    emb = (jnp.take(params["word_emb"], sentence_tensor, axis=0)
           + params["pos_emb"][None, :S, :]
           + params["type_emb"][0][None, None, :])          # token_type_ids = 0
    emb2d = emb.reshape(B * S, HIDDEN)

    # HF-style additive attention mask: (1 - mask) * -10000, shape (B, S)
    mask_add = (1.0 - sentence_mask.astype(jnp.float32)) * -10000.0

    sp = params["stacked"]
    out = pl.pallas_call(
        _encoder_kernel,
        out_shape=jax.ShapeDtypeStruct((B * S, HIDDEN), jnp.float32),
        compiler_params=pltpu.CompilerParams(vmem_limit_bytes=16 * 1024 * 1024),
    )(emb2d, mask_add, params["emb_ln_g"], params["emb_ln_b"],
      sp["qkv_w"], sp["qkv_b"], sp["ao_w"], sp["ao_b"],
      sp["ln1_g"], sp["ln1_b"],
      sp["i_w"], sp["i_b"], sp["o_w"], sp["o_b"],
      sp["ln2_g"], sp["ln2_b"])
    return out.reshape(B, S, HIDDEN)   # (B, S, HIDDEN) last_hidden_state


if __name__ == "__main__":
    key = jax.random.PRNGKey(0)
    pkey, ikey = jax.random.split(key)
    params = init_params(pkey)

    sentence_tensor = jax.random.randint(ikey, (BATCH, SEQ), 0, VOCAB, dtype=jnp.int32)
    # batch 0 fully valid; batch 1 has last two positions padded.
    sentence_mask = jnp.array(
        [[1] * SEQ, [1] * (SEQ - 2) + [0, 0]], dtype=jnp.int32)

    out = encoder_forward(params, sentence_tensor, sentence_mask)
    jax.block_until_ready(out)
    assert out.shape == (BATCH, SEQ, HIDDEN)
    assert bool(jnp.all(jnp.isfinite(out)))
    print("KERNEL_OK")
</pallas_src>

<mosaic_0001>
module attributes {stable_mosaic.version = 11 : i64} {
  func.func @_encoder_kernel(%arg0: memref<16x32xf32, #tpu.memory_space<vmem>>, %arg1: memref<2x8xf32, #tpu.memory_space<vmem>>, %arg2: memref<1x32xf32, #tpu.memory_space<vmem>>, %arg3: memref<1x32xf32, #tpu.memory_space<vmem>>, %arg4: memref<2x32x96xf32, #tpu.memory_space<vmem>>, %arg5: memref<2x1x96xf32, #tpu.memory_space<vmem>>, %arg6: memref<2x32x32xf32, #tpu.memory_space<vmem>>, %arg7: memref<2x1x32xf32, #tpu.memory_space<vmem>>, %arg8: memref<2x1x32xf32, #tpu.memory_space<vmem>>, %arg9: memref<2x1x32xf32, #tpu.memory_space<vmem>>, %arg10: memref<2x32x64xf32, #tpu.memory_space<vmem>>, %arg11: memref<2x1x64xf32, #tpu.memory_space<vmem>>, %arg12: memref<2x64x32xf32, #tpu.memory_space<vmem>>, %arg13: memref<2x1x32xf32, #tpu.memory_space<vmem>>, %arg14: memref<2x1x32xf32, #tpu.memory_space<vmem>>, %arg15: memref<2x1x32xf32, #tpu.memory_space<vmem>>, %arg16: memref<16x32xf32, #tpu.memory_space<vmem>>) attributes {dimension_semantics = [], scalar_prefetch = 0 : i64, scratch_operands = 0 : i64, tpu.core_type = #tpu.core_type<tc>} {
    %c0 = arith.constant 0 : index
    %c0_0 = arith.constant 0 : index
    %0 = vector.load %arg0[%c0, %c0_0] : memref<16x32xf32, #tpu.memory_space<vmem>>, vector<16x32xf32>
    %c0_1 = arith.constant 0 : index
    %c0_2 = arith.constant 0 : index
    %1 = vector.load %arg2[%c0_1, %c0_2] : memref<1x32xf32, #tpu.memory_space<vmem>>, vector<1x32xf32>
    %c0_3 = arith.constant 0 : index
    %c0_4 = arith.constant 0 : index
    %2 = vector.load %arg3[%c0_3, %c0_4] : memref<1x32xf32, #tpu.memory_space<vmem>>, vector<1x32xf32>
    %cst = arith.constant dense<0.000000e+00> : vector<16xf32>
    %3 = vector.multi_reduction <add>, %0, %cst [1] : vector<16x32xf32> to vector<16xf32>
    %4 = vector.shape_cast %3 : vector<16xf32> to vector<16x1xf32>
    %cst_5 = arith.constant 3.200000e+01 : f32
    %5 = vector.broadcast %cst_5 : f32 to vector<16x1xf32>
    %6 = arith.divf %4, %5 : vector<16x1xf32>
    %7 = vector.broadcast %6 : vector<16x1xf32> to vector<16x32xf32>
    %8 = arith.subf %0, %7 : vector<16x32xf32>
    %9 = vector.broadcast %6 : vector<16x1xf32> to vector<16x32xf32>
    %10 = arith.subf %0, %9 : vector<16x32xf32>
    %11 = arith.mulf %8, %10 : vector<16x32xf32>
    %cst_6 = arith.constant dense<0.000000e+00> : vector<16xf32>
    %12 = vector.multi_reduction <add>, %11, %cst_6 [1] : vector<16x32xf32> to vector<16xf32>
    %13 = vector.shape_cast %12 : vector<16xf32> to vector<16x1xf32>
    %cst_7 = arith.constant 3.200000e+01 : f32
    %14 = vector.broadcast %cst_7 : f32 to vector<16x1xf32>
    %15 = arith.divf %13, %14 : vector<16x1xf32>
    %16 = vector.broadcast %6 : vector<16x1xf32> to vector<16x32xf32>
    %17 = arith.subf %0, %16 : vector<16x32xf32>
    %cst_8 = arith.constant 9.99999996E-13 : f32
    %18 = vector.broadcast %cst_8 : f32 to vector<16x1xf32>
    %19 = arith.addf %15, %18 : vector<16x1xf32>
    %20 = math.rsqrt %19 : vector<16x1xf32>
    %21 = vector.broadcast %20 : vector<16x1xf32> to vector<16x32xf32>
    %22 = arith.mulf %17, %21 : vector<16x32xf32>
    %23 = vector.broadcast %1 : vector<1x32xf32> to vector<16x32xf32>
    %24 = arith.mulf %22, %23 : vector<16x32xf32>
    %25 = vector.broadcast %2 : vector<1x32xf32> to vector<16x32xf32>
    %26 = arith.addf %24, %25 : vector<16x32xf32>
    %c0_9 = arith.constant 0 : index
    %c0_10 = arith.constant 0 : index
    %27 = vector.load %arg1[%c0_9, %c0_10] : memref<2x8xf32, #tpu.memory_space<vmem>>, vector<2x8xf32>
    %c0_11 = arith.constant 0 : index
    %c0_12 = arith.constant 0 : index
    %c0_13 = arith.constant 0 : index
    %28 = vector.load %arg4[%c0_11, %c0_12, %c0_13] : memref<2x32x96xf32, #tpu.memory_space<vmem>>, vector<1x32x96xf32>
    %29 = vector.shape_cast %28 : vector<1x32x96xf32> to vector<32x96xf32>
    %cst_14 = arith.constant dense<0.000000e+00> : vector<16x96xf32>
    %30 = tpu.matmul %26, %29, %cst_14 {dimension_numbers = #tpu.dot_dimension_numbers<[1], [0], [0], [1], [0, 0, 1, 1], [], []>} : vector<16x32xf32>, vector<32x96xf32>, vector<16x96xf32> -> vector<16x96xf32>
    %c0_15 = arith.constant 0 : index
    %c0_16 = arith.constant 0 : index
    %c0_17 = arith.constant 0 : index
    %31 = vector.load %arg5[%c0_15, %c0_16, %c0_17] : memref<2x1x96xf32, #tpu.memory_space<vmem>>, vector<1x1x96xf32>
    %32 = vector.shape_cast %31 : vector<1x1x96xf32> to vector<1x96xf32>
    %33 = vector.broadcast %32 : vector<1x96xf32> to vector<16x96xf32>
    %34 = arith.addf %30, %33 : vector<16x96xf32>
    %35 = vector.extract_strided_slice %34 {offsets = [0, 0], sizes = [16, 32], strides = [1, 1]} : vector<16x96xf32> to vector<16x32xf32>
    %36 = vector.extract_strided_slice %34 {offsets = [0, 32], sizes = [16, 32], strides = [1, 1]} : vector<16x96xf32> to vector<16x32xf32>
    %37 = vector.extract_strided_slice %34 {offsets = [0, 64], sizes = [16, 32], strides = [1, 1]} : vector<16x96xf32> to vector<16x32xf32>
    %38 = vector.extract_strided_slice %27 {offsets = [0, 0], sizes = [1, 8], strides = [1, 1]} : vector<2x8xf32> to vector<1x8xf32>
    %39 = vector.extract_strided_slice %35 {offsets = [0, 0], sizes = [8, 16], strides = [1, 1]} : vector<16x32xf32> to vector<8x16xf32>
    %40 = vector.extract_strided_slice %36 {offsets = [0, 0], sizes = [8, 16], strides = [1, 1]} : vector<16x32xf32> to vector<8x16xf32>
    %41 = vector.extract_strided_slice %37 {offsets = [0, 0], sizes = [8, 16], strides = [1, 1]} : vector<16x32xf32> to vector<8x16xf32>
    %cst_18 = arith.constant dense<0.000000e+00> : vector<8x8xf32>
    %42 = tpu.matmul %39, %40, %cst_18 {dimension_numbers = #tpu.dot_dimension_numbers<[1], [1], [0], [0], [0, 0, 1, 0], [], []>} : vector<8x16xf32>, vector<8x16xf32>, vector<8x8xf32> -> vector<8x8xf32>
    %43 = vector.broadcast %38 : vector<1x8xf32> to vector<8x8xf32>
    %44 = arith.addf %42, %43 : vector<8x8xf32>
    %cst_19 = arith.constant dense<0xFF800000> : vector<8xf32>
    %45 = vector.multi_reduction <maximumf>, %44, %cst_19 [1] : vector<8x8xf32> to vector<8xf32>
    %46 = vector.shape_cast %45 : vector<8xf32> to vector<8x1xf32>
    %47 = vector.broadcast %46 : vector<8x1xf32> to vector<8x8xf32>
    %48 = arith.subf %44, %47 : vector<8x8xf32>
    %49 = math.exp %48 : vector<8x8xf32>
    %cst_20 = arith.constant dense<0.000000e+00> : vector<8xf32>
    %50 = vector.multi_reduction <add>, %49, %cst_20 [1] : vector<8x8xf32> to vector<8xf32>
    %51 = vector.shape_cast %50 : vector<8xf32> to vector<8x1xf32>
    %52 = tpu.reciprocal %51 {approx = true} : vector<8x1xf32> -> vector<8x1xf32>
    %53 = vector.broadcast %52 : vector<8x1xf32> to vector<8x8xf32>
    %54 = arith.mulf %49, %53 : vector<8x8xf32>
    %cst_21 = arith.constant dense<0.000000e+00> : vector<8x16xf32>
    %55 = tpu.matmul %54, %41, %cst_21 {dimension_numbers = #tpu.dot_dimension_numbers<[1], [0], [0], [1], [0, 0, 1, 1], [], []>} : vector<8x8xf32>, vector<8x16xf32>, vector<8x16xf32> -> vector<8x16xf32>
    %56 = vector.extract_strided_slice %35 {offsets = [0, 16], sizes = [8, 16], strides = [1, 1]} : vector<16x32xf32> to vector<8x16xf32>
    %57 = vector.extract_strided_slice %36 {offsets = [0, 16], sizes = [8, 16], strides = [1, 1]} : vector<16x32xf32> to vector<8x16xf32>
    %58 = vector.extract_strided_slice %37 {offsets = [0, 16], sizes = [8, 16], strides = [1, 1]} : vector<16x32xf32> to vector<8x16xf32>
    %cst_22 = arith.constant dense<0.000000e+00> : vector<8x8xf32>
    %59 = tpu.matmul %56, %57, %cst_22 {dimension_numbers = #tpu.dot_dimension_numbers<[1], [1], [0], [0], [0, 0, 1, 0], [], []>} : vector<8x16xf32>, vector<8x16xf32>, vector<8x8xf32> -> vector<8x8xf32>
    %60 = vector.broadcast %38 : vector<1x8xf32> to vector<8x8xf32>
    %61 = arith.addf %59, %60 : vector<8x8xf32>
    %cst_23 = arith.constant dense<0xFF800000> : vector<8xf32>
    %62 = vector.multi_reduction <maximumf>, %61, %cst_23 [1] : vector<8x8xf32> to vector<8xf32>
    %63 = vector.shape_cast %62 : vector<8xf32> to vector<8x1xf32>
    %64 = vector.broadcast %63 : vector<8x1xf32> to vector<8x8xf32>
    %65 = arith.subf %61, %64 : vector<8x8xf32>
    %66 = math.exp %65 : vector<8x8xf32>
    %cst_24 = arith.constant dense<0.000000e+00> : vector<8xf32>
    %67 = vector.multi_reduction <add>, %66, %cst_24 [1] : vector<8x8xf32> to vector<8xf32>
    %68 = vector.shape_cast %67 : vector<8xf32> to vector<8x1xf32>
    %69 = tpu.reciprocal %68 {approx = true} : vector<8x1xf32> -> vector<8x1xf32>
    %70 = vector.broadcast %69 : vector<8x1xf32> to vector<8x8xf32>
    %71 = arith.mulf %66, %70 : vector<8x8xf32>
    %cst_25 = arith.constant dense<0.000000e+00> : vector<8x16xf32>
    %72 = tpu.matmul %71, %58, %cst_25 {dimension_numbers = #tpu.dot_dimension_numbers<[1], [0], [0], [1], [0, 0, 1, 1], [], []>} : vector<8x8xf32>, vector<8x16xf32>, vector<8x16xf32> -> vector<8x16xf32>
    %73 = tpu.concatenate %55, %72 in 1 : vector<8x16xf32>, vector<8x16xf32> -> vector<8x32xf32>
    %74 = vector.extract_strided_slice %27 {offsets = [1, 0], sizes = [1, 8], strides = [1, 1]} : vector<2x8xf32> to vector<1x8xf32>
    %75 = vector.extract_strided_slice %35 {offsets = [8, 0], sizes = [8, 16], strides = [1, 1]} : vector<16x32xf32> to vector<8x16xf32>
    %76 = vector.extract_strided_slice %36 {offsets = [8, 0], sizes = [8, 16], strides = [1, 1]} : vector<16x32xf32> to vector<8x16xf32>
    %77 = vector.extract_strided_slice %37 {offsets = [8, 0], sizes = [8, 16], strides = [1, 1]} : vector<16x32xf32> to vector<8x16xf32>
    %cst_26 = arith.constant dense<0.000000e+00> : vector<8x8xf32>
    %78 = tpu.matmul %75, %76, %cst_26 {dimension_numbers = #tpu.dot_dimension_numbers<[1], [1], [0], [0], [0, 0, 1, 0], [], []>} : vector<8x16xf32>, vector<8x16xf32>, vector<8x8xf32> -> vector<8x8xf32>
    %79 = vector.broadcast %74 : vector<1x8xf32> to vector<8x8xf32>
    %80 = arith.addf %78, %79 : vector<8x8xf32>
    %cst_27 = arith.constant dense<0xFF800000> : vector<8xf32>
    %81 = vector.multi_reduction <maximumf>, %80, %cst_27 [1] : vector<8x8xf32> to vector<8xf32>
    %82 = vector.shape_cast %81 : vector<8xf32> to vector<8x1xf32>
    %83 = vector.broadcast %82 : vector<8x1xf32> to vector<8x8xf32>
    %84 = arith.subf %80, %83 : vector<8x8xf32>
    %85 = math.exp %84 : vector<8x8xf32>
    %cst_28 = arith.constant dense<0.000000e+00> : vector<8xf32>
    %86 = vector.multi_reduction <add>, %85, %cst_28 [1] : vector<8x8xf32> to vector<8xf32>
    %87 = vector.shape_cast %86 : vector<8xf32> to vector<8x1xf32>
    %88 = tpu.reciprocal %87 {approx = true} : vector<8x1xf32> -> vector<8x1xf32>
    %89 = vector.broadcast %88 : vector<8x1xf32> to vector<8x8xf32>
    %90 = arith.mulf %85, %89 : vector<8x8xf32>
    %cst_29 = arith.constant dense<0.000000e+00> : vector<8x16xf32>
    %91 = tpu.matmul %90, %77, %cst_29 {dimension_numbers = #tpu.dot_dimension_numbers<[1], [0], [0], [1], [0, 0, 1, 1], [], []>} : vector<8x8xf32>, vector<8x16xf32>, vector<8x16xf32> -> vector<8x16xf32>
    %92 = vector.extract_strided_slice %35 {offsets = [8, 16], sizes = [8, 16], strides = [1, 1]} : vector<16x32xf32> to vector<8x16xf32>
    %93 = vector.extract_strided_slice %36 {offsets = [8, 16], sizes = [8, 16], strides = [1, 1]} : vector<16x32xf32> to vector<8x16xf32>
    %94 = vector.extract_strided_slice %37 {offsets = [8, 16], sizes = [8, 16], strides = [1, 1]} : vector<16x32xf32> to vector<8x16xf32>
    %cst_30 = arith.constant dense<0.000000e+00> : vector<8x8xf32>
    %95 = tpu.matmul %92, %93, %cst_30 {dimension_numbers = #tpu.dot_dimension_numbers<[1], [1], [0], [0], [0, 0, 1, 0], [], []>} : vector<8x16xf32>, vector<8x16xf32>, vector<8x8xf32> -> vector<8x8xf32>
    %96 = vector.broadcast %74 : vector<1x8xf32> to vector<8x8xf32>
    %97 = arith.addf %95, %96 : vector<8x8xf32>
    %cst_31 = arith.constant dense<0xFF800000> : vector<8xf32>
    %98 = vector.multi_reduction <maximumf>, %97, %cst_31 [1] : vector<8x8xf32> to vector<8xf32>
    %99 = vector.shape_cast %98 : vector<8xf32> to vector<8x1xf32>
    %100 = vector.broadcast %99 : vector<8x1xf32> to vector<8x8xf32>
    %101 = arith.subf %97, %100 : vector<8x8xf32>
    %102 = math.exp %101 : vector<8x8xf32>
    %cst_32 = arith.constant dense<0.000000e+00> : vector<8xf32>
    %103 = vector.multi_reduction <add>, %102, %cst_32 [1] : vector<8x8xf32> to vector<8xf32>
    %104 = vector.shape_cast %103 : vector<8xf32> to vector<8x1xf32>
    %105 = tpu.reciprocal %104 {approx = true} : vector<8x1xf32> -> vector<8x1xf32>
    %106 = vector.broadcast %105 : vector<8x1xf32> to vector<8x8xf32>
    %107 = arith.mulf %102, %106 : vector<8x8xf32>
    %cst_33 = arith.constant dense<0.000000e+00> : vector<8x16xf32>
    %108 = tpu.matmul %107, %94, %cst_33 {dimension_numbers = #tpu.dot_dimension_numbers<[1], [0], [0], [1], [0, 0, 1, 1], [], []>} : vector<8x8xf32>, vector<8x16xf32>, vector<8x16xf32> -> vector<8x16xf32>
    %109 = tpu.concatenate %91, %108 in 1 : vector<8x16xf32>, vector<8x16xf32> -> vector<8x32xf32>
    %110 = tpu.concatenate %73, %109 in 0 : vector<8x32xf32>, vector<8x32xf32> -> vector<16x32xf32>
    %c0_34 = arith.constant 0 : index
    %c0_35 = arith.constant 0 : index
    %c0_36 = arith.constant 0 : index
    %111 = vector.load %arg6[%c0_34, %c0_35, %c0_36] : memref<2x32x32xf32, #tpu.memory_space<vmem>>, vector<1x32x32xf32>
    %112 = vector.shape_cast %111 : vector<1x32x32xf32> to vector<32x32xf32>
    %cst_37 = arith.constant dense<0.000000e+00> : vector<16x32xf32>
    %113 = tpu.matmul %110, %112, %cst_37 {dimension_numbers = #tpu.dot_dimension_numbers<[1], [0], [0], [1], [0, 0, 1, 1], [], []>} : vector<16x32xf32>, vector<32x32xf32>, vector<16x32xf32> -> vector<16x32xf32>
    %c0_38 = arith.constant 0 : index
    %c0_39 = arith.constant 0 : index
    %c0_40 = arith.constant 0 : index
    %114 = vector.load %arg7[%c0_38, %c0_39, %c0_40] : memref<2x1x32xf32, #tpu.memory_space<vmem>>, vector<1x1x32xf32>
    %115 = vector.shape_cast %114 : vector<1x1x32xf32> to vector<1x32xf32>
    %116 = vector.broadcast %115 : vector<1x32xf32> to vector<16x32xf32>
    %117 = arith.addf %113, %116 : vector<16x32xf32>
    %118 = arith.addf %117, %26 : vector<16x32xf32>
    %c0_41 = arith.constant 0 : index
    %c0_42 = arith.constant 0 : index
    %c0_43 = arith.constant 0 : index
    %119 = vector.load %arg8[%c0_41, %c0_42, %c0_43] : memref<2x1x32xf32, #tpu.memory_space<vmem>>, vector<1x1x32xf32>
    %120 = vector.shape_cast %119 : vector<1x1x32xf32> to vector<1x32xf32>
    %c0_44 = arith.constant 0 : index
    %c0_45 = arith.constant 0 : index
    %c0_46 = arith.constant 0 : index
    %121 = vector.load %arg9[%c0_44, %c0_45, %c0_46] : memref<2x1x32xf32, #tpu.memory_space<vmem>>, vector<1x1x32xf32>
    %122 = vector.shape_cast %121 : vector<1x1x32xf32> to vector<1x32xf32>
    %cst_47 = arith.constant dense<0.000000e+00> : vector<16xf32>
    %123 = vector.multi_reduction <add>, %118, %cst_47 [1] : vector<16x32xf32> to vector<16xf32>
    %124 = vector.shape_cast %123 : vector<16xf32> to vector<16x1xf32>
    %cst_48 = arith.constant 3.200000e+01 : f32
    %125 = vector.broadcast %cst_48 : f32 to vector<16x1xf32>
    %126 = arith.divf %124, %125 : vector<16x1xf32>
    %127 = vector.broadcast %126 : vector<16x1xf32> to vector<16x32xf32>
    %128 = arith.subf %118, %127 : vector<16x32xf32>
    %129 = vector.broadcast %126 : vector<16x1xf32> to vector<16x32xf32>
    %130 = arith.subf %118, %129 : vector<16x32xf32>
    %131 = arith.mulf %128, %130 : vector<16x32xf32>
    %cst_49 = arith.constant dense<0.000000e+00> : vector<16xf32>
    %132 = vector.multi_reduction <add>, %131, %cst_49 [1] : vector<16x32xf32> to vector<16xf32>
    %133 = vector.shape_cast %132 : vector<16xf32> to vector<16x1xf32>
    %cst_50 = arith.constant 3.200000e+01 : f32
    %134 = vector.broadcast %cst_50 : f32 to vector<16x1xf32>
    %135 = arith.divf %133, %134 : vector<16x1xf32>
    %136 = vector.broadcast %126 : vector<16x1xf32> to vector<16x32xf32>
    %137 = arith.subf %118, %136 : vector<16x32xf32>
    %cst_51 = arith.constant 9.99999996E-13 : f32
    %138 = vector.broadcast %cst_51 : f32 to vector<16x1xf32>
    %139 = arith.addf %135, %138 : vector<16x1xf32>
    %140 = math.rsqrt %139 : vector<16x1xf32>
    %141 = vector.broadcast %140 : vector<16x1xf32> to vector<16x32xf32>
    %142 = arith.mulf %137, %141 : vector<16x32xf32>
    %143 = vector.broadcast %120 : vector<1x32xf32> to vector<16x32xf32>
    %144 = arith.mulf %142, %143 : vector<16x32xf32>
    %145 = vector.broadcast %122 : vector<1x32xf32> to vector<16x32xf32>
    %146 = arith.addf %144, %145 : vector<16x32xf32>
    %c0_52 = arith.constant 0 : index
    %c0_53 = arith.constant 0 : index
    %c0_54 = arith.constant 0 : index
    %147 = vector.load %arg10[%c0_52, %c0_53, %c0_54] : memref<2x32x64xf32, #tpu.memory_space<vmem>>, vector<1x32x64xf32>
    %148 = vector.shape_cast %147 : vector<1x32x64xf32> to vector<32x64xf32>
    %cst_55 = arith.constant dense<0.000000e+00> : vector<16x64xf32>
    %149 = tpu.matmul %146, %148, %cst_55 {dimension_numbers = #tpu.dot_dimension_numbers<[1], [0], [0], [1], [0, 0, 1, 1], [], []>} : vector<16x32xf32>, vector<32x64xf32>, vector<16x64xf32> -> vector<16x64xf32>
    %c0_56 = arith.constant 0 : index
    %c0_57 = arith.constant 0 : index
    %c0_58 = arith.constant 0 : index
    %150 = vector.load %arg11[%c0_56, %c0_57, %c0_58] : memref<2x1x64xf32, #tpu.memory_space<vmem>>, vector<1x1x64xf32>
    %151 = vector.shape_cast %150 : vector<1x1x64xf32> to vector<1x64xf32>
    %152 = vector.broadcast %151 : vector<1x64xf32> to vector<16x64xf32>
    %153 = arith.addf %149, %152 : vector<16x64xf32>
    %cst_59 = arith.constant 5.000000e-01 : f32
    %154 = vector.broadcast %cst_59 : f32 to vector<16x64xf32>
    %155 = arith.mulf %154, %153 : vector<16x64xf32>
    %cst_60 = arith.constant 4.471500e-02 : f32
    %156 = vector.broadcast %cst_60 : f32 to vector<16x64xf32>
    %157 = arith.mulf %156, %153 : vector<16x64xf32>
    %158 = arith.mulf %157, %153 : vector<16x64xf32>
    %159 = arith.mulf %158, %153 : vector<16x64xf32>
    %160 = arith.addf %153, %159 : vector<16x64xf32>
    %cst_61 = arith.constant 0.797884583 : f32
    %161 = vector.broadcast %cst_61 : f32 to vector<16x64xf32>
    %162 = arith.mulf %161, %160 : vector<16x64xf32>
    %163 = math.tanh %162 : vector<16x64xf32>
    %cst_62 = arith.constant 1.000000e+00 : f32
    %164 = vector.broadcast %cst_62 : f32 to vector<16x64xf32>
    %165 = arith.addf %164, %163 : vector<16x64xf32>
    %166 = arith.mulf %155, %165 : vector<16x64xf32>
    %c0_63 = arith.constant 0 : index
    %c0_64 = arith.constant 0 : index
    %c0_65 = arith.constant 0 : index
    %167 = vector.load %arg12[%c0_63, %c0_64, %c0_65] : memref<2x64x32xf32, #tpu.memory_space<vmem>>, vector<1x64x32xf32>
    %168 = vector.shape_cast %167 : vector<1x64x32xf32> to vector<64x32xf32>
    %cst_66 = arith.constant dense<0.000000e+00> : vector<16x32xf32>
    %169 = tpu.matmul %166, %168, %cst_66 {dimension_numbers = #tpu.dot_dimension_numbers<[1], [0], [0], [1], [0, 0, 1, 1], [], []>} : vector<16x64xf32>, vector<64x32xf32>, vector<16x32xf32> -> vector<16x32xf32>
    %c0_67 = arith.constant 0 : index
    %c0_68 = arith.constant 0 : index
    %c0_69 = arith.constant 0 : index
    %170 = vector.load %arg13[%c0_67, %c0_68, %c0_69] : memref<2x1x32xf32, #tpu.memory_space<vmem>>, vector<1x1x32xf32>
    %171 = vector.shape_cast %170 : vector<1x1x32xf32> to vector<1x32xf32>
    %172 = vector.broadcast %171 : vector<1x32xf32> to vector<16x32xf32>
    %173 = arith.addf %169, %172 : vector<16x32xf32>
    %174 = arith.addf %173, %146 : vector<16x32xf32>
    %c0_70 = arith.constant 0 : index
    %c0_71 = arith.constant 0 : index
    %c0_72 = arith.constant 0 : index
    %175 = vector.load %arg14[%c0_70, %c0_71, %c0_72] : memref<2x1x32xf32, #tpu.memory_space<vmem>>, vector<1x1x32xf32>
    %176 = vector.shape_cast %175 : vector<1x1x32xf32> to vector<1x32xf32>
    %c0_73 = arith.constant 0 : index
    %c0_74 = arith.constant 0 : index
    %c0_75 = arith.constant 0 : index
    %177 = vector.load %arg15[%c0_73, %c0_74, %c0_75] : memref<2x1x32xf32, #tpu.memory_space<vmem>>, vector<1x1x32xf32>
    %178 = vector.shape_cast %177 : vector<1x1x32xf32> to vector<1x32xf32>
    %cst_76 = arith.constant dense<0.000000e+00> : vector<16xf32>
    %179 = vector.multi_reduction <add>, %174, %cst_76 [1] : vector<16x32xf32> to vector<16xf32>
    %180 = vector.shape_cast %179 : vector<16xf32> to vector<16x1xf32>
    %cst_77 = arith.constant 3.200000e+01 : f32
    %181 = vector.broadcast %cst_77 : f32 to vector<16x1xf32>
    %182 = arith.divf %180, %181 : vector<16x1xf32>
    %183 = vector.broadcast %182 : vector<16x1xf32> to vector<16x32xf32>
    %184 = arith.subf %174, %183 : vector<16x32xf32>
    %185 = vector.broadcast %182 : vector<16x1xf32> to vector<16x32xf32>
    %186 = arith.subf %174, %185 : vector<16x32xf32>
    %187 = arith.mulf %184, %186 : vector<16x32xf32>
    %cst_78 = arith.constant dense<0.000000e+00> : vector<16xf32>
    %188 = vector.multi_reduction <add>, %187, %cst_78 [1] : vector<16x32xf32> to vector<16xf32>
    %189 = vector.shape_cast %188 : vector<16xf32> to vector<16x1xf32>
    %cst_79 = arith.constant 3.200000e+01 : f32
    %190 = vector.broadcast %cst_79 : f32 to vector<16x1xf32>
    %191 = arith.divf %189, %190 : vector<16x1xf32>
    %192 = vector.broadcast %182 : vector<16x1xf32> to vector<16x32xf32>
    %193 = arith.subf %174, %192 : vector<16x32xf32>
    %cst_80 = arith.constant 9.99999996E-13 : f32
    %194 = vector.broadcast %cst_80 : f32 to vector<16x1xf32>
    %195 = arith.addf %191, %194 : vector<16x1xf32>
    %196 = math.rsqrt %195 : vector<16x1xf32>
    %197 = vector.broadcast %196 : vector<16x1xf32> to vector<16x32xf32>
    %198 = arith.mulf %193, %197 : vector<16x32xf32>
    %199 = vector.broadcast %176 : vector<1x32xf32> to vector<16x32xf32>
    %200 = arith.mulf %198, %199 : vector<16x32xf32>
    %201 = vector.broadcast %178 : vector<1x32xf32> to vector<16x32xf32>
    %202 = arith.addf %200, %201 : vector<16x32xf32>
    %c1 = arith.constant 1 : index
    %c0_81 = arith.constant 0 : index
    %c0_82 = arith.constant 0 : index
    %203 = vector.load %arg4[%c1, %c0_81, %c0_82] : memref<2x32x96xf32, #tpu.memory_space<vmem>>, vector<1x32x96xf32>
    %204 = vector.shape_cast %203 : vector<1x32x96xf32> to vector<32x96xf32>
    %cst_83 = arith.constant dense<0.000000e+00> : vector<16x96xf32>
    %205 = tpu.matmul %202, %204, %cst_83 {dimension_numbers = #tpu.dot_dimension_numbers<[1], [0], [0], [1], [0, 0, 1, 1], [], []>} : vector<16x32xf32>, vector<32x96xf32>, vector<16x96xf32> -> vector<16x96xf32>
    %c1_84 = arith.constant 1 : index
    %c0_85 = arith.constant 0 : index
    %c0_86 = arith.constant 0 : index
    %206 = vector.load %arg5[%c1_84, %c0_85, %c0_86] : memref<2x1x96xf32, #tpu.memory_space<vmem>>, vector<1x1x96xf32>
    %207 = vector.shape_cast %206 : vector<1x1x96xf32> to vector<1x96xf32>
    %208 = vector.broadcast %207 : vector<1x96xf32> to vector<16x96xf32>
    %209 = arith.addf %205, %208 : vector<16x96xf32>
    %210 = vector.extract_strided_slice %209 {offsets = [0, 0], sizes = [16, 32], strides = [1, 1]} : vector<16x96xf32> to vector<16x32xf32>
    %211 = vector.extract_strided_slice %209 {offsets = [0, 32], sizes = [16, 32], strides = [1, 1]} : vector<16x96xf32> to vector<16x32xf32>
    %212 = vector.extract_strided_slice %209 {offsets = [0, 64], sizes = [16, 32], strides = [1, 1]} : vector<16x96xf32> to vector<16x32xf32>
    %213 = vector.extract_strided_slice %27 {offsets = [0, 0], sizes = [1, 8], strides = [1, 1]} : vector<2x8xf32> to vector<1x8xf32>
    %214 = vector.extract_strided_slice %210 {offsets = [0, 0], sizes = [8, 16], strides = [1, 1]} : vector<16x32xf32> to vector<8x16xf32>
    %215 = vector.extract_strided_slice %211 {offsets = [0, 0], sizes = [8, 16], strides = [1, 1]} : vector<16x32xf32> to vector<8x16xf32>
    %216 = vector.extract_strided_slice %212 {offsets = [0, 0], sizes = [8, 16], strides = [1, 1]} : vector<16x32xf32> to vector<8x16xf32>
    %cst_87 = arith.constant dense<0.000000e+00> : vector<8x8xf32>
    %217 = tpu.matmul %214, %215, %cst_87 {dimension_numbers = #tpu.dot_dimension_numbers<[1], [1], [0], [0], [0, 0, 1, 0], [], []>} : vector<8x16xf32>, vector<8x16xf32>, vector<8x8xf32> -> vector<8x8xf32>
    %218 = vector.broadcast %213 : vector<1x8xf32> to vector<8x8xf32>
    %219 = arith.addf %217, %218 : vector<8x8xf32>
    %cst_88 = arith.constant dense<0xFF800000> : vector<8xf32>
    %220 = vector.multi_reduction <maximumf>, %219, %cst_88 [1] : vector<8x8xf32> to vector<8xf32>
    %221 = vector.shape_cast %220 : vector<8xf32> to vector<8x1xf32>
    %222 = vector.broadcast %221 : vector<8x1xf32> to vector<8x8xf32>
    %223 = arith.subf %219, %222 : vector<8x8xf32>
    %224 = math.exp %223 : vector<8x8xf32>
    %cst_89 = arith.constant dense<0.000000e+00> : vector<8xf32>
    %225 = vector.multi_reduction <add>, %224, %cst_89 [1] : vector<8x8xf32> to vector<8xf32>
    %226 = vector.shape_cast %225 : vector<8xf32> to vector<8x1xf32>
    %227 = tpu.reciprocal %226 {approx = true} : vector<8x1xf32> -> vector<8x1xf32>
    %228 = vector.broadcast %227 : vector<8x1xf32> to vector<8x8xf32>
    %229 = arith.mulf %224, %228 : vector<8x8xf32>
    %cst_90 = arith.constant dense<0.000000e+00> : vector<8x16xf32>
    %230 = tpu.matmul %229, %216, %cst_90 {dimension_numbers = #tpu.dot_dimension_numbers<[1], [0], [0], [1], [0, 0, 1, 1], [], []>} : vector<8x8xf32>, vector<8x16xf32>, vector<8x16xf32> -> vector<8x16xf32>
    %231 = vector.extract_strided_slice %210 {offsets = [0, 16], sizes = [8, 16], strides = [1, 1]} : vector<16x32xf32> to vector<8x16xf32>
    %232 = vector.extract_strided_slice %211 {offsets = [0, 16], sizes = [8, 16], strides = [1, 1]} : vector<16x32xf32> to vector<8x16xf32>
    %233 = vector.extract_strided_slice %212 {offsets = [0, 16], sizes = [8, 16], strides = [1, 1]} : vector<16x32xf32> to vector<8x16xf32>
    %cst_91 = arith.constant dense<0.000000e+00> : vector<8x8xf32>
    %234 = tpu.matmul %231, %232, %cst_91 {dimension_numbers = #tpu.dot_dimension_numbers<[1], [1], [0], [0], [0, 0, 1, 0], [], []>} : vector<8x16xf32>, vector<8x16xf32>, vector<8x8xf32> -> vector<8x8xf32>
    %235 = vector.broadcast %213 : vector<1x8xf32> to vector<8x8xf32>
    %236 = arith.addf %234, %235 : vector<8x8xf32>
    %cst_92 = arith.constant dense<0xFF800000> : vector<8xf32>
    %237 = vector.multi_reduction <maximumf>, %236, %cst_92 [1] : vector<8x8xf32> to vector<8xf32>
    %238 = vector.shape_cast %237 : vector<8xf32> to vector<8x1xf32>
    %239 = vector.broadcast %238 : vector<8x1xf32> to vector<8x8xf32>
    %240 = arith.subf %236, %239 : vector<8x8xf32>
    %241 = math.exp %240 : vector<8x8xf32>
    %cst_93 = arith.constant dense<0.000000e+00> : vector<8xf32>
    %242 = vector.multi_reduction <add>, %241, %cst_93 [1] : vector<8x8xf32> to vector<8xf32>
    %243 = vector.shape_cast %242 : vector<8xf32> to vector<8x1xf32>
    %244 = tpu.reciprocal %243 {approx = true} : vector<8x1xf32> -> vector<8x1xf32>
    %245 = vector.broadcast %244 : vector<8x1xf32> to vector<8x8xf32>
    %246 = arith.mulf %241, %245 : vector<8x8xf32>
    %cst_94 = arith.constant dense<0.000000e+00> : vector<8x16xf32>
    %247 = tpu.matmul %246, %233, %cst_94 {dimension_numbers = #tpu.dot_dimension_numbers<[1], [0], [0], [1], [0, 0, 1, 1], [], []>} : vector<8x8xf32>, vector<8x16xf32>, vector<8x16xf32> -> vector<8x16xf32>
    %248 = tpu.concatenate %230, %247 in 1 : vector<8x16xf32>, vector<8x16xf32> -> vector<8x32xf32>
    %249 = vector.extract_strided_slice %27 {offsets = [1, 0], sizes = [1, 8], strides = [1, 1]} : vector<2x8xf32> to vector<1x8xf32>
    %250 = vector.extract_strided_slice %210 {offsets = [8, 0], sizes = [8, 16], strides = [1, 1]} : vector<16x32xf32> to vector<8x16xf32>
    %251 = vector.extract_strided_slice %211 {offsets = [8, 0], sizes = [8, 16], strides = [1, 1]} : vector<16x32xf32> to vector<8x16xf32>
    %252 = vector.extract_strided_slice %212 {offsets = [8, 0], sizes = [8, 16], strides = [1, 1]} : vector<16x32xf32> to vector<8x16xf32>
    %cst_95 = arith.constant dense<0.000000e+00> : vector<8x8xf32>
    %253 = tpu.matmul %250, %251, %cst_95 {dimension_numbers = #tpu.dot_dimension_numbers<[1], [1], [0], [0], [0, 0, 1, 0], [], []>} : vector<8x16xf32>, vector<8x16xf32>, vector<8x8xf32> -> vector<8x8xf32>
    %254 = vector.broadcast %249 : vector<1x8xf32> to vector<8x8xf32>
    %255 = arith.addf %253, %254 : vector<8x8xf32>
    %cst_96 = arith.constant dense<0xFF800000> : vector<8xf32>
    %256 = vector.multi_reduction <maximumf>, %255, %cst_96 [1] : vector<8x8xf32> to vector<8xf32>
    %257 = vector.shape_cast %256 : vector<8xf32> to vector<8x1xf32>
    %258 = vector.broadcast %257 : vector<8x1xf32> to vector<8x8xf32>
    %259 = arith.subf %255, %258 : vector<8x8xf32>
    %260 = math.exp %259 : vector<8x8xf32>
    %cst_97 = arith.constant dense<0.000000e+00> : vector<8xf32>
    %261 = vector.multi_reduction <add>, %260, %cst_97 [1] : vector<8x8xf32> to vector<8xf32>
    %262 = vector.shape_cast %261 : vector<8xf32> to vector<8x1xf32>
    %263 = tpu.reciprocal %262 {approx = true} : vector<8x1xf32> -> vector<8x1xf32>
    %264 = vector.broadcast %263 : vector<8x1xf32> to vector<8x8xf32>
    %265 = arith.mulf %260, %264 : vector<8x8xf32>
    %cst_98 = arith.constant dense<0.000000e+00> : vector<8x16xf32>
    %266 = tpu.matmul %265, %252, %cst_98 {dimension_numbers = #tpu.dot_dimension_numbers<[1], [0], [0], [1], [0, 0, 1, 1], [], []>} : vector<8x8xf32>, vector<8x16xf32>, vector<8x16xf32> -> vector<8x16xf32>
    %267 = vector.extract_strided_slice %210 {offsets = [8, 16], sizes = [8, 16], strides = [1, 1]} : vector<16x32xf32> to vector<8x16xf32>
    %268 = vector.extract_strided_slice %211 {offsets = [8, 16], sizes = [8, 16], strides = [1, 1]} : vector<16x32xf32> to vector<8x16xf32>
    %269 = vector.extract_strided_slice %212 {offsets = [8, 16], sizes = [8, 16], strides = [1, 1]} : vector<16x32xf32> to vector<8x16xf32>
    %cst_99 = arith.constant dense<0.000000e+00> : vector<8x8xf32>
    %270 = tpu.matmul %267, %268, %cst_99 {dimension_numbers = #tpu.dot_dimension_numbers<[1], [1], [0], [0], [0, 0, 1, 0], [], []>} : vector<8x16xf32>, vector<8x16xf32>, vector<8x8xf32> -> vector<8x8xf32>
    %271 = vector.broadcast %249 : vector<1x8xf32> to vector<8x8xf32>
    %272 = arith.addf %270, %271 : vector<8x8xf32>
    %cst_100 = arith.constant dense<0xFF800000> : vector<8xf32>
    %273 = vector.multi_reduction <maximumf>, %272, %cst_100 [1] : vector<8x8xf32> to vector<8xf32>
    %274 = vector.shape_cast %273 : vector<8xf32> to vector<8x1xf32>
    %275 = vector.broadcast %274 : vector<8x1xf32> to vector<8x8xf32>
    %276 = arith.subf %272, %275 : vector<8x8xf32>
    %277 = math.exp %276 : vector<8x8xf32>
    %cst_101 = arith.constant dense<0.000000e+00> : vector<8xf32>
    %278 = vector.multi_reduction <add>, %277, %cst_101 [1] : vector<8x8xf32> to vector<8xf32>
    %279 = vector.shape_cast %278 : vector<8xf32> to vector<8x1xf32>
    %280 = tpu.reciprocal %279 {approx = true} : vector<8x1xf32> -> vector<8x1xf32>
    %281 = vector.broadcast %280 : vector<8x1xf32> to vector<8x8xf32>
    %282 = arith.mulf %277, %281 : vector<8x8xf32>
    %cst_102 = arith.constant dense<0.000000e+00> : vector<8x16xf32>
    %283 = tpu.matmul %282, %269, %cst_102 {dimension_numbers = #tpu.dot_dimension_numbers<[1], [0], [0], [1], [0, 0, 1, 1], [], []>} : vector<8x8xf32>, vector<8x16xf32>, vector<8x16xf32> -> vector<8x16xf32>
    %284 = tpu.concatenate %266, %283 in 1 : vector<8x16xf32>, vector<8x16xf32> -> vector<8x32xf32>
    %285 = tpu.concatenate %248, %284 in 0 : vector<8x32xf32>, vector<8x32xf32> -> vector<16x32xf32>
    %c1_103 = arith.constant 1 : index
    %c0_104 = arith.constant 0 : index
    %c0_105 = arith.constant 0 : index
    %286 = vector.load %arg6[%c1_103, %c0_104, %c0_105] : memref<2x32x32xf32, #tpu.memory_space<vmem>>, vector<1x32x32xf32>
    %287 = vector.shape_cast %286 : vector<1x32x32xf32> to vector<32x32xf32>
    %cst_106 = arith.constant dense<0.000000e+00> : vector<16x32xf32>
    %288 = tpu.matmul %285, %287, %cst_106 {dimension_numbers = #tpu.dot_dimension_numbers<[1], [0], [0], [1], [0, 0, 1, 1], [], []>} : vector<16x32xf32>, vector<32x32xf32>, vector<16x32xf32> -> vector<16x32xf32>
    %c1_107 = arith.constant 1 : index
    %c0_108 = arith.constant 0 : index
    %c0_109 = arith.constant 0 : index
    %289 = vector.load %arg7[%c1_107, %c0_108, %c0_109] : memref<2x1x32xf32, #tpu.memory_space<vmem>>, vector<1x1x32xf32>
    %290 = vector.shape_cast %289 : vector<1x1x32xf32> to vector<1x32xf32>
    %291 = vector.broadcast %290 : vector<1x32xf32> to vector<16x32xf32>
    %292 = arith.addf %288, %291 : vector<16x32xf32>
    %293 = arith.addf %292, %202 : vector<16x32xf32>
    %c1_110 = arith.constant 1 : index
    %c0_111 = arith.constant 0 : index
    %c0_112 = arith.constant 0 : index
    %294 = vector.load %arg8[%c1_110, %c0_111, %c0_112] : memref<2x1x32xf32, #tpu.memory_space<vmem>>, vector<1x1x32xf32>
    %295 = vector.shape_cast %294 : vector<1x1x32xf32> to vector<1x32xf32>
    %c1_113 = arith.constant 1 : index
    %c0_114 = arith.constant 0 : index
    %c0_115 = arith.constant 0 : index
    %296 = vector.load %arg9[%c1_113, %c0_114, %c0_115] : memref<2x1x32xf32, #tpu.memory_space<vmem>>, vector<1x1x32xf32>
    %297 = vector.shape_cast %296 : vector<1x1x32xf32> to vector<1x32xf32>
    %cst_116 = arith.constant dense<0.000000e+00> : vector<16xf32>
    %298 = vector.multi_reduction <add>, %293, %cst_116 [1] : vector<16x32xf32> to vector<16xf32>
    %299 = vector.shape_cast %298 : vector<16xf32> to vector<16x1xf32>
    %cst_117 = arith.constant 3.200000e+01 : f32
    %300 = vector.broadcast %cst_117 : f32 to vector<16x1xf32>
    %301 = arith.divf %299, %300 : vector<16x1xf32>
    %302 = vector.broadcast %301 : vector<16x1xf32> to vector<16x32xf32>
    %303 = arith.subf %293, %302 : vector<16x32xf32>
    %304 = vector.broadcast %301 : vector<16x1xf32> to vector<16x32xf32>
    %305 = arith.subf %293, %304 : vector<16x32xf32>
    %306 = arith.mulf %303, %305 : vector<16x32xf32>
    %cst_118 = arith.constant dense<0.000000e+00> : vector<16xf32>
    %307 = vector.multi_reduction <add>, %306, %cst_118 [1] : vector<16x32xf32> to vector<16xf32>
    %308 = vector.shape_cast %307 : vector<16xf32> to vector<16x1xf32>
    %cst_119 = arith.constant 3.200000e+01 : f32
    %309 = vector.broadcast %cst_119 : f32 to vector<16x1xf32>
    %310 = arith.divf %308, %309 : vector<16x1xf32>
    %311 = vector.broadcast %301 : vector<16x1xf32> to vector<16x32xf32>
    %312 = arith.subf %293, %311 : vector<16x32xf32>
    %cst_120 = arith.constant 9.99999996E-13 : f32
    %313 = vector.broadcast %cst_120 : f32 to vector<16x1xf32>
    %314 = arith.addf %310, %313 : vector<16x1xf32>
    %315 = math.rsqrt %314 : vector<16x1xf32>
    %316 = vector.broadcast %315 : vector<16x1xf32> to vector<16x32xf32>
    %317 = arith.mulf %312, %316 : vector<16x32xf32>
    %318 = vector.broadcast %295 : vector<1x32xf32> to vector<16x32xf32>
    %319 = arith.mulf %317, %318 : vector<16x32xf32>
    %320 = vector.broadcast %297 : vector<1x32xf32> to vector<16x32xf32>
    %321 = arith.addf %319, %320 : vector<16x32xf32>
    %c1_121 = arith.constant 1 : index
    %c0_122 = arith.constant 0 : index
    %c0_123 = arith.constant 0 : index
    %322 = vector.load %arg10[%c1_121, %c0_122, %c0_123] : memref<2x32x64xf32, #tpu.memory_space<vmem>>, vector<1x32x64xf32>
    %323 = vector.shape_cast %322 : vector<1x32x64xf32> to vector<32x64xf32>
    %cst_124 = arith.constant dense<0.000000e+00> : vector<16x64xf32>
    %324 = tpu.matmul %321, %323, %cst_124 {dimension_numbers = #tpu.dot_dimension_numbers<[1], [0], [0], [1], [0, 0, 1, 1], [], []>} : vector<16x32xf32>, vector<32x64xf32>, vector<16x64xf32> -> vector<16x64xf32>
    %c1_125 = arith.constant 1 : index
    %c0_126 = arith.constant 0 : index
    %c0_127 = arith.constant 0 : index
    %325 = vector.load %arg11[%c1_125, %c0_126, %c0_127] : memref<2x1x64xf32, #tpu.memory_space<vmem>>, vector<1x1x64xf32>
    %326 = vector.shape_cast %325 : vector<1x1x64xf32> to vector<1x64xf32>
    %327 = vector.broadcast %326 : vector<1x64xf32> to vector<16x64xf32>
    %328 = arith.addf %324, %327 : vector<16x64xf32>
    %cst_128 = arith.constant 5.000000e-01 : f32
    %329 = vector.broadcast %cst_128 : f32 to vector<16x64xf32>
    %330 = arith.mulf %329, %328 : vector<16x64xf32>
    %cst_129 = arith.constant 4.471500e-02 : f32
    %331 = vector.broadcast %cst_129 : f32 to vector<16x64xf32>
    %332 = arith.mulf %331, %328 : vector<16x64xf32>
    %333 = arith.mulf %332, %328 : vector<16x64xf32>
    %334 = arith.mulf %333, %328 : vector<16x64xf32>
    %335 = arith.addf %328, %334 : vector<16x64xf32>
    %cst_130 = arith.constant 0.797884583 : f32
    %336 = vector.broadcast %cst_130 : f32 to vector<16x64xf32>
    %337 = arith.mulf %336, %335 : vector<16x64xf32>
    %338 = math.tanh %337 : vector<16x64xf32>
    %cst_131 = arith.constant 1.000000e+00 : f32
    %339 = vector.broadcast %cst_131 : f32 to vector<16x64xf32>
    %340 = arith.addf %339, %338 : vector<16x64xf32>
    %341 = arith.mulf %330, %340 : vector<16x64xf32>
    %c1_132 = arith.constant 1 : index
    %c0_133 = arith.constant 0 : index
    %c0_134 = arith.constant 0 : index
    %342 = vector.load %arg12[%c1_132, %c0_133, %c0_134] : memref<2x64x32xf32, #tpu.memory_space<vmem>>, vector<1x64x32xf32>
    %343 = vector.shape_cast %342 : vector<1x64x32xf32> to vector<64x32xf32>
    %cst_135 = arith.constant dense<0.000000e+00> : vector<16x32xf32>
    %344 = tpu.matmul %341, %343, %cst_135 {dimension_numbers = #tpu.dot_dimension_numbers<[1], [0], [0], [1], [0, 0, 1, 1], [], []>} : vector<16x64xf32>, vector<64x32xf32>, vector<16x32xf32> -> vector<16x32xf32>
    %c1_136 = arith.constant 1 : index
    %c0_137 = arith.constant 0 : index
    %c0_138 = arith.constant 0 : index
    %345 = vector.load %arg13[%c1_136, %c0_137, %c0_138] : memref<2x1x32xf32, #tpu.memory_space<vmem>>, vector<1x1x32xf32>
    %346 = vector.shape_cast %345 : vector<1x1x32xf32> to vector<1x32xf32>
    %347 = vector.broadcast %346 : vector<1x32xf32> to vector<16x32xf32>
    %348 = arith.addf %344, %347 : vector<16x32xf32>
    %349 = arith.addf %348, %321 : vector<16x32xf32>
    %c1_139 = arith.constant 1 : index
    %c0_140 = arith.constant 0 : index
    %c0_141 = arith.constant 0 : index
    %350 = vector.load %arg14[%c1_139, %c0_140, %c0_141] : memref<2x1x32xf32, #tpu.memory_space<vmem>>, vector<1x1x32xf32>
    %351 = vector.shape_cast %350 : vector<1x1x32xf32> to vector<1x32xf32>
    %c1_142 = arith.constant 1 : index
    %c0_143 = arith.constant 0 : index
    %c0_144 = arith.constant 0 : index
    %352 = vector.load %arg15[%c1_142, %c0_143, %c0_144] : memref<2x1x32xf32, #tpu.memory_space<vmem>>, vector<1x1x32xf32>
    %353 = vector.shape_cast %352 : vector<1x1x32xf32> to vector<1x32xf32>
    %cst_145 = arith.constant dense<0.000000e+00> : vector<16xf32>
    %354 = vector.multi_reduction <add>, %349, %cst_145 [1] : vector<16x32xf32> to vector<16xf32>
    %355 = vector.shape_cast %354 : vector<16xf32> to vector<16x1xf32>
    %cst_146 = arith.constant 3.200000e+01 : f32
    %356 = vector.broadcast %cst_146 : f32 to vector<16x1xf32>
    %357 = arith.divf %355, %356 : vector<16x1xf32>
    %358 = vector.broadcast %357 : vector<16x1xf32> to vector<16x32xf32>
    %359 = arith.subf %349, %358 : vector<16x32xf32>
    %360 = vector.broadcast %357 : vector<16x1xf32> to vector<16x32xf32>
    %361 = arith.subf %349, %360 : vector<16x32xf32>
    %362 = arith.mulf %359, %361 : vector<16x32xf32>
    %cst_147 = arith.constant dense<0.000000e+00> : vector<16xf32>
    %363 = vector.multi_reduction <add>, %362, %cst_147 [1] : vector<16x32xf32> to vector<16xf32>
    %364 = vector.shape_cast %363 : vector<16xf32> to vector<16x1xf32>
    %cst_148 = arith.constant 3.200000e+01 : f32
    %365 = vector.broadcast %cst_148 : f32 to vector<16x1xf32>
    %366 = arith.divf %364, %365 : vector<16x1xf32>
    %367 = vector.broadcast %357 : vector<16x1xf32> to vector<16x32xf32>
    %368 = arith.subf %349, %367 : vector<16x32xf32>
    %cst_149 = arith.constant 9.99999996E-13 : f32
    %369 = vector.broadcast %cst_149 : f32 to vector<16x1xf32>
    %370 = arith.addf %366, %369 : vector<16x1xf32>
    %371 = math.rsqrt %370 : vector<16x1xf32>
    %372 = vector.broadcast %371 : vector<16x1xf32> to vector<16x32xf32>
    %373 = arith.mulf %368, %372 : vector<16x32xf32>
    %374 = vector.broadcast %351 : vector<1x32xf32> to vector<16x32xf32>
    %375 = arith.mulf %373, %374 : vector<16x32xf32>
    %376 = vector.broadcast %353 : vector<1x32xf32> to vector<16x32xf32>
    %377 = arith.addf %375, %376 : vector<16x32xf32>
    %c0_150 = arith.constant 0 : index
    %c0_151 = arith.constant 0 : index
    %378 = vector.load %arg16[%c0_150, %c0_151] : memref<16x32xf32, #tpu.memory_space<vmem>>, vector<16x32xf32>
    tpu.vector_store %arg16[%c0_150, %c0_151], %377 {strides = array<i32>} : memref<16x32xf32, #tpu.memory_space<vmem>>, vector<16x32xf32>,
    return
  }
}

</mosaic_0001>

<bundles_post_ra>
// kernel: encoder_forward.1
= control target key start
LH: loop header
LB: loop body
LE: loop exit
PB: predicated region body
PF: predicated region fallthrough
CT: control target
= control target key end

     0   :  { %s3399_s0 = inlined_call_operand.vmem [shape: f32[16,32], index: 0, kind: input, shape index: {}]   ;;  %s3400_s1 = inlined_call_operand.vmem [shape: f32[2,8], index: 1, kind: input, shape index: {}]   ;;  %s3401_s2 = inlined_call_operand.vmem [shape: f32[1,32], index: 2, kind: input, shape index: {}]   ;;  %s3402_s3 = inlined_call_operand.vmem [shape: f32[1,32], index: 3, kind: input, shape index: {}]   ;;  %s3403_s4 = inlined_call_operand.vmem [shape: f32[2,32,96], index: 4, kind: input, shape index: {}]   ;;  %s3404_s5 = inlined_call_operand.vmem [shape: f32[2,1,96], index: 5, kind: input, shape index: {}]   ;;  %s3405_s6 = inlined_call_operand.vmem [shape: f32[2,32,32], index: 6, kind: input, shape index: {}]   ;;  %s3406_s7 = inlined_call_operand.vmem [shape: f32[2,1,32], index: 7, kind: input, shape index: {}]   ;;  %s3407_s8 = inlined_call_operand.vmem [shape: f32[2,1,32], index: 8, kind: input, shape index: {}]   ;;  %s3408_s9 = inlined_call_operand.vmem [shape: f32[2,1,32], index: 9, kind: input, shape index: {}]   ;;  %s3409_s10 = inlined_call_operand.vmem [shape: f32[2,32,64], index: 10, kind: input, shape index: {}]   ;;  %s3410_s11 = inlined_call_operand.vmem [shape: f32[2,1,64], index: 11, kind: input, shape index: {}]   ;;  %s3411_s12 = inlined_call_operand.vmem [shape: f32[2,64,32], index: 12, kind: input, shape index: {}]   ;;  %s3412_s13 = inlined_call_operand.vmem [shape: f32[2,1,32], index: 13, kind: input, shape index: {}]   ;;  %s3413_s14 = inlined_call_operand.vmem [shape: f32[2,1,32], index: 14, kind: input, shape index: {}]   ;;  %s3414_s15 = inlined_call_operand.vmem [shape: f32[2,1,32], index: 15, kind: input, shape index: {}]   ;;  %s3415_s16 = inlined_call_operand.hbm [shape: f32[16,32], index: 16, kind: output, shape index: {}]  }
   0x1   :  { %3417 = sst [smem:[#allocation5_spill]] %s3399_s0 }
   0x2   :  { %s3418_s23 = sld [smem:[#allocation5_spill]]  ;;  %vm58_vm0 = vcmask 261120  }
   0x8   :  { %v54_v0 = vld [vmem:[%s3418_s23] sm:$0xff]  ;;  %v55_v1 = vld [vmem:[%s3418_s23 + $0x8] sm:$0xff] }
   0x9   :  { %21 = vsyncpa [#allocation3], 0  ;;  %v59_v2 = vsel %vm58_vm0, %v54_v0, 0.0  ;;  %v62_v3 = vsel %vm58_vm0, %v55_v1, 0.0  ;;  %v106_v14 = vld [vmem:[%s3403_s4 + $0x18] sm:$0xff]  ;;  %v105_v15 = vld [vmem:[%s3403_s4 + $0x10] sm:$0xff]  ;;  %v195_v46 = vlaneseq }
   0xa   :  { %60 = vadd.xlane.f32.xlu0 %v59_v2  ;;  %2618 = vmatprep.subr.mxu1 %v106_v14  ;;  %v104_v16 = vld [vmem:[%s3403_s4 + $0x8] sm:$0xff]  ;;  %v103_v17 = vld [vmem:[%s3403_s4] sm:$0xff]  ;;  %v2895_v34 = vmov 0.0   ;;  %vm2896_vm1 = vmmov 0   ;;  %s2897_s23 = smov 80   ;;  %s2898_s24 = smov 96  }
   0xb   :  { %2619 = vmatpush3.msra.mxu1 %v106_v14  ;;  %v2444_v25 = vld [vmem:[%s3401_s2] ss:$0 sm:$0xff]  ;;  %2639 = vmatprep.subr.mxu0 %v2895_v34  ;;  %s2899_s25 = smov 112   ;;  %vm202_vm2 = vcmask 130048   ;;  %v196_v47 = vshrl.u32 %v195_v46, 7  ;;  %vm277_vm3 = vcmask 64512  }
   0xc   :  { %2620 = vmatprep.subr.mxu1 %v105_v15  ;;  %v2445_v27 = vld [vmem:[%s3402_s3] ss:$0 sm:$0xff]  ;;  %2641 = vmatprep.mubr.msk.f32.mxu0 %vm2896_vm1, %v2895_v34  ;;  %s2901_s28 = smov 64   ;;  %v874_v46 = vld [vmem:[%s3405_s6 + $0x8] sm:$0xff]  ;;  %s2902_s22 = smov 16   ;;  %vm1136_vm4 = vcmask 523264  }
   0xd   :  { %2621 = vmatpush3.msra.mxu1 %v105_v15  ;;  %v2446_v36 = vld [vmem:[%s3404_s5] ss:$0 sm:$0xff]  ;;  %v197_v48 = vsub.s32 0, %v196_v47  ;;  %v537_v54 = vsub.s32 1, %v196_v47 }
   0xe   :  { %63 = vadd.xlane.f32.xlu0 %v62_v3  ;;  %2622 = vmatprep.subr.mxu1 %v104_v16  ;;  %v102_v49 = vld [vmem:[%s3400_s1] sm:$0x3]  ;;  %s2900_s1 = smov 48  }
   0xf   :  { %2623 = vmatpush3.msra.mxu1 %v104_v16  ;;  %v3074_v50 = vrot.slane %v102_v49, %v197_v48  ;;  %v3080_v60 = vrot.slane %v102_v49, %v537_v54  ;;  %v873_v47 = vld [vmem:[%s3405_s6] sm:$0xff] }
  0x10   :  { %2624 = vmatprep.subr.mxu1 %v103_v17 }
  0x11   :  { %2625 = vmatpush3.msra.mxu1 %v103_v17 }
  0x12   :  { %2629 = vmatprep.subr.mxu1 %v2895_v34 }
  0x93   :  { %v61_v4 = vpop.xlane.xlu0 %60 }
  0x94   :  { %v66_v5 = vmul.f32 0.03125, %v61_v4 }
  0x96   :  { %v68_v6 = vsub.f32 %v54_v0, %v66_v5 }
  0x97   :  { %v64_v7 = vpop.xlane.xlu0 %63 }
  0x98   :  { %v67_v8 = vmul.f32 0.03125, %v64_v7  ;;  %v70_v9 = vmul.f32 %v68_v6, %v68_v6 }
  0x9a   :  { %v69_v10 = vsub.f32 %v55_v1, %v67_v8  ;;  %v72_v11 = vsel %vm58_vm0, %v70_v9, 0.0 }
  0x9b   :  { %73 = vadd.xlane.f32.xlu1 %v72_v11 }
  0x9c   :  { %v71_v12 = vmul.f32 %v69_v10, %v69_v10 }
  0x9e   :  { %v75_v13 = vsel %vm58_vm0, %v71_v12, 0.0 }
  0x9f   :  { %76 = vadd.xlane.f32.xlu1 %v75_v13 }
 0x124   :  { %v74_v18 = vpop.xlane.xlu1 %73 }
 0x125   :  { %v78_v19 = vmul.f32 0.03125, %v74_v18 }
 0x127   :  { %v80_v20 = vadd.f32 1e-12, %v78_v19 }
 0x128   :  { %v77_v21 = vpop.xlane.xlu1 %76 }
 0x129   :  { %2813 = vrsqrt.f32 %v80_v20  ;;  %v79_v22 = vmul.f32 0.03125, %v77_v21 }
 0x12b   :  { %v81_v23 = vadd.f32 1e-12, %v79_v22 }
 0x12d   :  { %2815 = vrsqrt.f32 %v81_v23 }
 0x136   :  { %v2814_v24 = vpop.eup %2813 }
 0x137   :  { %v84_v26 = vmul.f32 %v2814_v24, %v68_v6 }
 0x139   :  { %v92_v28 = vmul.f32 %v2444_v25, %v84_v26 }
 0x13a   :  { %v2816_v29 = vpop.eup %2815 }
 0x13b   :  { %v85_v30 = vmul.f32 %v2816_v29, %v69_v10  ;;  %v3019_v31 = vadd.f32 %v2445_v27, %v92_v28 }
 0x13d   :  { %v93_v32 = vmul.f32 %v2444_v25, %v85_v30  ;;  %2626 = vmatprep.mubr.msk.f32.mxu1 %vm58_vm0, %v3019_v31 }
 0x13f   :  { %v3023_v33 = vadd.f32 %v2445_v27, %v93_v32 }
 0x141   :  { %2627 = vmatmul.mubr.msk.f32.vlgmr.msra.gmra.mxu1 %vm58_vm0, %v3023_v33 }
 0x142   :  { %2631 = vmatprep.mubr.msk.f32.mxu1 %vm2896_vm1, %v2895_v34 }
 0x201   :  { %v2628_v35 = vpop.f32.mrf.mxu1 }
 0x202   :  { %v3042_v39 = vadd.f32 %v2628_v35, %v2446_v36 }
 0x203   :  { %v186_v37 = vpop.f32.mrf.mxu1 }
 0x204   :  { %v3036_v38 = vadd.f32 %v2446_v36, %v186_v37 }
 0x206   :  { %367 = vrot.lane.b32.xlu1 %v3036_v38, %s2897_s23  ;;  %200 = vrot.lane.b32.xlu0 %v3036_v38, %s2898_s24 }
 0x20a   :  { %365 = vrot.lane.b32.xlu1 %v3036_v38, %s2899_s25  ;;  %705 = vrot.lane.b32.xlu0 %v3042_v39, %s2897_s23 }
 0x20e   :  { %540 = vrot.lane.b32.xlu1 %v3042_v39, %s2898_s24 }
 0x212   :  { %703 = vrot.lane.b32.xlu1 %v3042_v39, %s2899_s25 }
 0x278   :  { %v368_v40 = vpop.permute.xlu1 %367  ;;  %v201_v41 = vpop.permute.xlu0 %200 }
 0x279   :  { %2630 = vmatpush3.xpose.msk.msra.mxu1 %vm202_vm2, %v201_v41  ;;  %2640 = vmatpush3.xpose.msk.msra.mxu0 %vm202_vm2, %v368_v40 }
 0x27a   :  { %2649 = vmatprep.subr.mxu0 %v2895_v34  ;;  %2634 = vmatprep.subr.mxu1 %v2895_v34 }
 0x27c   :  { %v366_v42 = vpop.permute.xlu1 %365  ;;  %2632 = vmatmul.mubr.msk.f32.vlgmr.msra.gmra.mxu1 %vm202_vm2, %v3036_v38  ;;  %v706_v44 = vpop.permute.xlu0 %705 }
 0x27d   :  { %2642 = vmatmul.mubr.msk.f32.vlgmr.msra.gmra.mxu0 %vm202_vm2, %v366_v42  ;;  %2636 = vmatprep.mubr.msk.f32.mxu1 %vm2896_vm1, %v2895_v34 }
 0x27e   :  { %2651 = vmatprep.mubr.msk.f32.mxu0 %vm2896_vm1, %v2895_v34 }
 0x280   :  { %v541_v43 = vpop.permute.xlu1 %540 }
 0x281   :  { %2650 = vmatpush3.xpose.msk.msra.mxu0 %vm202_vm2, %v541_v43 }
 0x282   :  { %2659 = vmatprep.subr.mxu0 %v2895_v34 }
 0x284   :  { %2652 = vmatmul.mubr.msk.f32.vlgmr.msra.gmra.mxu0 %vm202_vm2, %v3042_v39  ;;  %v704_v45 = vpop.permute.xlu1 %703 }
 0x285   :  { %2660 = vmatpush3.xpose.msk.msra.mxu0 %vm202_vm2, %v706_v44  ;;  %2661 = vmatprep.mubr.msk.f32.mxu0 %vm2896_vm1, %v2895_v34  ;;  %v876_v44 = vld [vmem:[%s3405_s6 + $0x18] sm:$0xff] }
 0x286   :  { %2669 = vmatprep.subr.mxu0 %v876_v44 }
 0x288   :  { %2662 = vmatmul.mubr.msk.f32.vlgmr.msra.gmra.mxu0 %vm202_vm2, %v704_v45  ;;  %v875_v45 = vld [vmem:[%s3405_s6 + $0x10] sm:$0xff] }
 0x289   :  { %2670 = vmatpush3.msra.mxu0 %v876_v44  ;;  %v1122_v44 = vld [vmem:[%s3411_s12 + $0x8] sm:$0xff] }
 0x28a   :  { %2671 = vmatprep.subr.mxu0 %v875_v45 }
 0x28b   :  { %2672 = vmatpush3.msra.mxu0 %v875_v45  ;;  %v1121_v45 = vld [vmem:[%s3411_s12] sm:$0xff] }
 0x28c   :  { %2673 = vmatprep.subr.mxu0 %v874_v46 }
 0x28d   :  { %2674 = vmatpush3.msra.mxu0 %v874_v46  ;;  %v2466_v46 = vld [vmem:[%s3410_s11] ss:$0 sm:$0xff] }
 0x28e   :  { %2675 = vmatprep.subr.mxu0 %v873_v47 }
 0x28f   :  { %2676 = vmatpush3.msra.mxu0 %v873_v47 }
 0x33c   :  { %v273_v51 = vpop.f32.mrf.mxu1 }
 0x33d   :  { %v274_v52 = vadd.f32 %v273_v51, %v3074_v50  ;;  %v439_v53 = vpop.f32.mrf.mxu0 }
 0x33e   :  { %v440_v55 = vadd.f32 %v439_v53, %v3074_v50  ;;  %v2633_v56 = vpop.f32.mrf.mxu1 }
 0x33f   :  { %v2643_v57 = vpop.f32.mrf.mxu0  ;;  %v278_v58 = vsel %vm277_vm3, %v274_v52, -inf }
 0x340   :  { %279 = vmax.xlane.f32.xlu0 %v278_v58  ;;  %v443_v59 = vsel %vm277_vm3, %v440_v55, -inf }
 0x341   :  { %444 = vmax.xlane.f32.xlu1 %v443_v59 }
 0x344   :  { %v612_v61 = vpop.f32.mrf.mxu0 }
 0x345   :  { %v613_v62 = vadd.f32 %v612_v61, %v3080_v60 }
 0x346   :  { %v2653_v63 = vpop.f32.mrf.mxu0 }
 0x347   :  { %v616_v0 = vsel %vm277_vm3, %v613_v62, -inf }
 0x348   :  { %617 = vmax.xlane.f32.xlu0 %v616_v0  ;;  %v777_v1 = vpop.f32.mrf.mxu0 }
 0x349   :  { %v778_v2 = vadd.f32 %v777_v1, %v3080_v60 }
 0x34a   :  { %v2663_v3 = vpop.f32.mrf.mxu0 }
 0x34b   :  { %v781_v4 = vsel %vm277_vm3, %v778_v2, -inf }
 0x34c   :  { %782 = vmax.xlane.f32.xlu0 %v781_v4 }
 0x3c9   :  { %v280_v5 = vpop.xlane.xlu0 %279 }
 0x3ca   :  { %v281_v6 = vsub.f32 %v274_v52, %v280_v5  ;;  %v445_v7 = vpop.xlane.xlu1 %444 }
 0x3cb   :  { %v446_v8 = vsub.f32 %v440_v55, %v445_v7 }
 0x3cc   :  { %v282_v9 = vmul.f32 1.442695, %v281_v6 }
 0x3cd   :  { %v447_v10 = vmul.f32 1.442695, %v446_v8 }
 0x3ce   :  { %2817 = vpow2.f32 %v282_v9 }
 0x3cf   :  { %2819 = vpow2.f32 %v447_v10 }
 0x3d1   :  { %v618_v11 = vpop.xlane.xlu0 %617 }
 0x3d2   :  { %v619_v12 = vsub.f32 %v613_v62, %v618_v11  ;;  %v2461_v62 = vld [vmem:[%s3406_s7] ss:$0 sm:$0xff] }
 0x3d4   :  { %v620_v13 = vmul.f32 1.442695, %v619_v12 }
 0x3d5   :  { %v783_v20 = vpop.xlane.xlu0 %782 }
 0x3d6   :  { %2821 = vpow2.f32 %v620_v13  ;;  %v784_v21 = vsub.f32 %v778_v2, %v783_v20 }
 0x3d8   :  { %v785_v22 = vmul.f32 1.442695, %v784_v21 }
 0x3da   :  { %2823 = vpow2.f32 %v785_v22 }
 0x3db   :  { %v2818_v14 = vpop.eup %2817 }
 0x3dc   :  { %v2820_v15 = vpop.eup %2819  ;;  %v284_v16 = vsel %vm277_vm3, %v2818_v14, 0.0 }
 0x3dd   :  { %285 = vadd.xlane.f32.xlu0 %v284_v16  ;;  %v449_v17 = vsel %vm277_vm3, %v2820_v15, 0.0  ;;  %v1013_v16 = vld [vmem:[%s3409_s10 + $0x10] sm:$0xff] }
 0x3de   :  { %450 = vadd.xlane.f32.xlu1 %v449_v17  ;;  %v1012_v17 = vld [vmem:[%s3409_s10 + $0x8] sm:$0xff] }
 0x3e3   :  { %v2822_v18 = vpop.eup %2821 }
 0x3e4   :  { %v622_v19 = vsel %vm277_vm3, %v2822_v18, 0.0 }
 0x3e5   :  { %623 = vadd.xlane.f32.xlu0 %v622_v19 }
 0x3e7   :  { %v2824_v23 = vpop.eup %2823 }
 0x3e8   :  { %v787_v24 = vsel %vm277_vm3, %v2824_v23, 0.0 }
 0x3ef   :  { %454 = vrot.lane.b32.xlu1 %v3036_v38, %s2900_s1 }
 0x3f3   :  { %627 = vrot.lane.b32.xlu1 %v3042_v39, %s2901_s28 }
 0x3fb   :  { %289 = vrot.lane.b32.xlu0 %v3036_v38, %s2901_s28 }
 0x417   :  { %788 = vadd.xlane.f32.xlu1 %v787_v24 }
 0x428   :  { %792 = vrot.lane.b32.xlu1 %v3042_v39, %s2900_s1 }
 0x466   :  { %v286_v25 = vpop.xlane.xlu0 %285 }
 0x467   :  { %2825 = vrcp.f32 %v286_v25  ;;  %v451_v26 = vpop.xlane.xlu1 %450 }
 0x468   :  { %2827 = vrcp.f32 %v451_v26  ;;  %v2464_v26 = vld [vmem:[%s3407_s8] ss:$0 sm:$0xff] }
 0x46b   :  { %v455_v30 = vpop.permute.xlu1 %454 }
 0x46e   :  { %v624_v27 = vpop.xlane.xlu0 %623 }
 0x46f   :  { %2829 = vrcp.f32 %v624_v27  ;;  %v628_v37 = vpop.permute.xlu1 %627 }
 0x472   :  { %v290_v28 = vpop.permute.xlu0 %289 }
 0x473   :  { %2635 = vmatpush3.msra.mxu1 %v290_v28  ;;  %v2465_v28 = vld [vmem:[%s3408_s9] ss:$0 sm:$0xff] }
 0x474   :  { %v2826_v29 = vpop.eup %2825  ;;  %2644 = vmatprep.subr.mxu1 %v2895_v34 }
 0x475   :  { %v288_v32 = vmul.f32 %v2826_v29, %v2818_v14  ;;  %v2828_v35 = vpop.eup %2827 }
 0x476   :  { %v453_v36 = vmul.f32 %v2828_v35, %v2820_v15 }
 0x477   :  { %2637 = vmatmul.mubr.msk.f32.vlgmr.msra.gmra.mxu1 %vm277_vm3, %v288_v32 }
 0x478   :  { %2645 = vmatpush3.msra.mxu1 %v455_v30  ;;  %2646 = vmatprep.mubr.msk.f32.mxu1 %vm2896_vm1, %v2895_v34 }
 0x479   :  { %2654 = vmatprep.subr.mxu1 %v2895_v34 }
 0x47b   :  { %2647 = vmatmul.mubr.msk.f32.vlgmr.msra.gmra.mxu1 %vm277_vm3, %v453_v36 }
 0x47c   :  { %v2830_v38 = vpop.eup %2829  ;;  %2655 = vmatpush3.msra.mxu1 %v628_v37  ;;  %2656 = vmatprep.mubr.msk.f32.mxu1 %vm2896_vm1, %v2895_v34 }
 0x47d   :  { %v626_v39 = vmul.f32 %v2830_v38, %v2822_v18  ;;  %2664 = vmatprep.subr.mxu1 %v2895_v34  ;;  %v1011_v18 = vld [vmem:[%s3409_s10] sm:$0xff]  ;;  %v1128_v38 = vld [vmem:[%s3411_s12 + $0x38] sm:$0xff] }
 0x47e   :  { %2691 = vmatprep.subr.mxu0 %v1128_v38 }
 0x47f   :  { %2657 = vmatmul.mubr.msk.f32.vlgmr.msra.gmra.mxu1 %vm277_vm3, %v626_v39  ;;  %v1127_v39 = vld [vmem:[%s3411_s12 + $0x30] sm:$0xff] }
 0x480   :  { %2666 = vmatprep.mubr.msk.f32.mxu1 %vm2896_vm1, %v2895_v34 }
 0x4a0   :  { %v789_v40 = vpop.xlane.xlu1 %788 }
 0x4a1   :  { %2831 = vrcp.f32 %v789_v40  ;;  %v1126_v40 = vld [vmem:[%s3411_s12 + $0x28] sm:$0xff] }
 0x4a4   :  { %v793_v41 = vpop.permute.xlu1 %792 }
 0x4a5   :  { %2665 = vmatpush3.msra.mxu1 %v793_v41  ;;  %v1125_v41 = vld [vmem:[%s3411_s12 + $0x20] sm:$0xff] }
 0x4ae   :  { %v2832_v42 = vpop.eup %2831 }
 0x4af   :  { %v791_v43 = vmul.f32 %v2832_v42, %v2824_v23  ;;  %v1124_v42 = vld [vmem:[%s3411_s12 + $0x18] sm:$0xff] }
 0x4b1   :  { %2667 = vmatmul.mubr.msk.f32.vlgmr.msra.gmra.mxu1 %vm277_vm3, %v791_v43  ;;  %v1123_v43 = vld [vmem:[%s3411_s12 + $0x10] sm:$0xff] }
 0x537   :  { %v361_v48 = vpop.f32.mrf.mxu1 }
 0x539   :  { %v2638_v49 = vpop.f32.mrf.mxu1 }
 0x53b   :  { %v526_v51 = vpop.f32.mrf.mxu1 }
 0x53c   :  { %531 = vrot.lane.b32.xlu0 %v526_v51, %s2902_s22 }
 0x53d   :  { %v2648_v52 = vpop.f32.mrf.mxu1 }
 0x53f   :  { %v699_v53 = vpop.f32.mrf.mxu1 }
 0x541   :  { %v2658_v54 = vpop.f32.mrf.mxu1 }
 0x571   :  { %v864_v55 = vpop.f32.mrf.mxu1 }
 0x572   :  { %869 = vrot.lane.b32.xlu1 %v864_v55, %s2902_s22 }
 0x573   :  { %v2668_v56 = vpop.f32.mrf.mxu1 }
 0x5ae   :  { %v532_v57 = vpop.permute.xlu0 %531 }
 0x5af   :  { %v534_v58 = vsel %vm202_vm2, %v361_v48, %v532_v57 }
 0x5b0   :  { %2677 = vmatprep.mubr.msk.f32.mxu0 %vm58_vm0, %v534_v58 }
 0x5e4   :  { %v870_v59 = vpop.permute.xlu1 %869 }
 0x5e5   :  { %v872_v61 = vsel %vm202_vm2, %v699_v53, %v870_v59 }
 0x5e6   :  { %2678 = vmatmul.mubr.msk.f32.vlgmr.msra.gmra.mxu0 %vm58_vm0, %v872_v61 }
 0x5e7   :  { %2692 = vmatpush3.msra.mxu0 %v1128_v38  ;;  %v2472_v38 = vld [vmem:[%s3413_s14] ss:$0 sm:$0xff] }
 0x5e8   :  { %2693 = vmatprep.subr.mxu0 %v1127_v39 }
 0x5e9   :  { %2694 = vmatpush3.msra.mxu0 %v1127_v39 }
 0x5ea   :  { %2695 = vmatprep.subr.mxu0 %v1126_v40 }
 0x5eb   :  { %2696 = vmatpush3.msra.mxu0 %v1126_v40 }
 0x5ec   :  { %2697 = vmatprep.subr.mxu0 %v1125_v41 }
 0x5ed   :  { %2698 = vmatpush3.msra.mxu0 %v1125_v41 }
 0x5ee   :  { %2699 = vmatprep.subr.mxu0 %v1124_v42 }
 0x5ef   :  { %2700 = vmatpush3.msra.mxu0 %v1124_v42 }
 0x5f0   :  { %2701 = vmatprep.subr.mxu0 %v1123_v43 }
 0x5f1   :  { %2702 = vmatpush3.msra.mxu0 %v1123_v43  ;;  %v2473_v43 = vld [vmem:[%s3414_s15] ss:$0 sm:$0xff] }
 0x5f2   :  { %2703 = vmatprep.subr.mxu0 %v1122_v44 }
 0x5f3   :  { %2704 = vmatpush3.msra.mxu0 %v1122_v44 }
 0x5f4   :  { %2705 = vmatprep.subr.mxu0 %v1121_v45 }
 0x5f5   :  { %2706 = vmatpush3.msra.mxu0 %v1121_v45 }
 0x5f6   :  { %2731 = vmatprep.subr.mxu0 %v2895_v34 }
 0x6a6   :  { %v2679_v63 = vpop.f32.mrf.mxu0 }
 0x6a7   :  { %v962_v0 = vadd.f32 %v2679_v63, %v2461_v62 }
 0x6a8   :  { %v956_v1 = vpop.f32.mrf.mxu0 }
 0x6a9   :  { %v957_v2 = vadd.f32 %v2461_v62, %v956_v1  ;;  %v966_v3 = vadd.f32 %v962_v0, %v3023_v33 }
 0x6ab   :  { %v972_v4 = vsel %vm58_vm0, %v966_v3, 0.0  ;;  %v965_v5 = vadd.f32 %v957_v2, %v3019_v31  ;;  %v1014_v31 = vld [vmem:[%s3409_s10 + $0x18] sm:$0xff] }
 0x6ac   :  { %973 = vadd.xlane.f32.xlu1 %v972_v4  ;;  %2680 = vmatprep.subr.mxu1 %v1014_v31 }
 0x6ad   :  { %v969_v6 = vsel %vm58_vm0, %v965_v5, 0.0  ;;  %2681 = vmatpush3.msra.mxu1 %v1014_v31 }
 0x6ae   :  { %970 = vadd.xlane.f32.xlu0 %v969_v6  ;;  %2682 = vmatprep.subr.mxu1 %v1013_v16 }
 0x6af   :  { %2683 = vmatpush3.msra.mxu1 %v1013_v16 }
 0x6b0   :  { %2684 = vmatprep.subr.mxu1 %v1012_v17 }
 0x6b1   :  { %2685 = vmatpush3.msra.mxu1 %v1012_v17 }
 0x6b2   :  { %2686 = vmatprep.subr.mxu1 %v1011_v18 }
 0x6b3   :  { %2687 = vmatpush3.msra.mxu1 %v1011_v18 }
 0x735   :  { %v974_v7 = vpop.xlane.xlu1 %973 }
 0x736   :  { %v976_v8 = vmul.f32 0.03125, %v974_v7  ;;  %v2469_v7 = vld [vmem:[%s3412_s13] ss:$0 sm:$0xff] }
 0x737   :  { %v971_v9 = vpop.xlane.xlu0 %970 }
 0x738   :  { %v975_v10 = vmul.f32 0.03125, %v971_v9  ;;  %v978_v11 = vsub.f32 %v966_v3, %v976_v8 }
 0x73a   :  { %v977_v12 = vsub.f32 %v965_v5, %v975_v10  ;;  %v980_v15 = vmul.f32 %v978_v11, %v978_v11 }
 0x73c   :  { %v979_v13 = vmul.f32 %v977_v12, %v977_v12  ;;  %v984_v33 = vsel %vm58_vm0, %v980_v15, 0.0 }
 0x73e   :  { %v981_v14 = vsel %vm58_vm0, %v979_v13, 0.0 }
 0x73f   :  { %982 = vadd.xlane.f32.xlu0 %v981_v14 }
 0x743   :  { %985 = vadd.xlane.f32.xlu0 %v984_v33 }
 0x7c8   :  { %v983_v19 = vpop.xlane.xlu0 %982 }
 0x7c9   :  { %v987_v20 = vmul.f32 0.03125, %v983_v19 }
 0x7cb   :  { %v989_v21 = vadd.f32 1e-12, %v987_v20 }
 0x7cc   :  { %v986_v22 = vpop.xlane.xlu0 %985 }
 0x7cd   :  { %2833 = vrsqrt.f32 %v989_v21  ;;  %v988_v23 = vmul.f32 0.03125, %v986_v22 }
 0x7cf   :  { %v990_v24 = vadd.f32 1e-12, %v988_v23 }
 0x7d1   :  { %2835 = vrsqrt.f32 %v990_v24  ;;  %v2477_v24 = vld [vmem:[%s3403_s4 + $0x38] sm:$0xff] }
 0x7d2   :  { %2710 = vmatprep.subr.mxu1 %v2477_v24 }
 0x7da   :  { %v2834_v25 = vpop.eup %2833 }
 0x7db   :  { %v993_v27 = vmul.f32 %v2834_v25, %v977_v12  ;;  %v2476_v25 = vld [vmem:[%s3403_s4 + $0x30] sm:$0xff] }
 0x7dd   :  { %v1001_v29 = vmul.f32 %v2464_v26, %v993_v27  ;;  %v2474_v27 = vld [vmem:[%s3403_s4 + $0x20] sm:$0xff] }
 0x7de   :  { %v2836_v30 = vpop.eup %2835 }
 0x7df   :  { %v994_v32 = vmul.f32 %v2836_v30, %v978_v11  ;;  %v3156_v35 = vadd.f32 %v2465_v28, %v1001_v29 }
 0x7e1   :  { %v1002_v36 = vmul.f32 %v2464_v26, %v994_v32  ;;  %2688 = vmatprep.mubr.msk.f32.mxu1 %vm58_vm0, %v3156_v35  ;;  %v2475_v26 = vld [vmem:[%s3403_s4 + $0x28] sm:$0xff]  ;;  %s2903_s4 = smov [#allocation2]  }
 0x7e2   :  { %s2433_s18 = sshll.u32 %s2903_s4, 4  ;;  %s2434_s18 = int_to_ptr.vmem [resolvable:$true] %s2433_s18 }
 0x7e3   :  { %v1010_v37 = vadd.f32 %v2465_v28, %v1002_v36  ;;  %s2873_s19 = scalar_lea.vmem %s2434_s18, 256  ;;  %p2878_p1 = scmp.lt.s32.totalorder %s2434_s18, %s2434_s18 }
 0x7e4   :  { %p2874_p0 = scmp.ne.s32.totalorder %s2434_s18, %s2873_s19  ;;  %p2879_p2 = scmp.lt.s32.totalorder %s2873_s19, %s2873_s19 }
 0x7e5   :  { %2689 = vmatmul.mubr.msk.f32.vlgmr.msra.gmra.mxu1 %vm58_vm0, %v1010_v37 }
 0x7e6   :  { %2711 = vmatpush3.msra.mxu1 %v2477_v24  ;;  %p2880_p3 = por %p2879_p2, %p2878_p1 }
 0x7e7   :  { %2712 = vmatprep.subr.mxu1 %v2476_v25 }
 0x7e8   :  { %2713 = vmatpush3.msra.mxu1 %v2476_v25  ;;  %p2881_p4 = pnand %p2880_p3, %p2874_p0 }
 0x7e9   :  { %2714 = vmatprep.subr.mxu1 %v2475_v26 }
 0x7ea   :  { %2715 = vmatpush3.msra.mxu1 %v2475_v26 }
 0x7eb   :  { %2716 = vmatprep.subr.mxu1 %v2474_v27 }
 0x7ec   :  { %2717 = vmatpush3.msra.mxu1 %v2474_v27 }
 0x7ed   :  { %2721 = vmatprep.subr.mxu1 %v2895_v34 }
 0x8a5   :  { %v2690_v47 = vpop.f32.mrf.mxu1 }
 0x8a6   :  { %v1100_v48 = vadd.f32 %v2690_v47, %v2466_v46 }
 0x8a7   :  { %v1094_v49 = vpop.f32.mrf.mxu1 }
 0x8a8   :  { %v1106_v51 = vmul.f32 0.044715, %v1100_v48  ;;  %v1095_v52 = vadd.f32 %v2466_v46, %v1094_v49  ;;  %v1104_v4 = vmul.f32 0.5, %v1100_v48 }
 0x8aa   :  { %v1108_v53 = vmul.f32 %v1106_v51, %v1100_v48  ;;  %v1105_v54 = vmul.f32 0.044715, %v1095_v52  ;;  %v1103_v2 = vmul.f32 0.5, %v1095_v52 }
 0x8ac   :  { %v1110_v55 = vmul.f32 %v1108_v53, %v1100_v48  ;;  %v1107_v56 = vmul.f32 %v1105_v54, %v1095_v52 }
 0x8ae   :  { %v1112_v57 = vadd.f32 %v1110_v55, %v1100_v48  ;;  %v1109_v58 = vmul.f32 %v1107_v56, %v1095_v52  ;;  %v2479_v48 = vld [vmem:[%s3404_s5 + $0x1] ss:$0 sm:$0xff] }
 0x8b0   :  { %v1114_v59 = vmul.f32 0.7978846, %v1112_v57  ;;  %v1111_v61 = vadd.f32 %v1109_v58, %v1095_v52 }
 0x8b2   :  { %2837 = vtanh.f32 %v1114_v59  ;;  %v1113_v62 = vmul.f32 0.7978846, %v1111_v61 }
 0x8b4   :  { %2839 = vtanh.f32 %v1113_v62 }
 0x8bf   :  { %v2838_v63 = vpop.eup %2837 }
 0x8c0   :  { %v1118_v1 = vadd.f32 1.0, %v2838_v63 }
 0x8c1   :  { %v2840_v0 = vpop.eup %2839 }
 0x8c2   :  { %v1117_v3 = vadd.f32 1.0, %v2840_v0  ;;  %v1120_v6 = vmul.f32 %v1118_v1, %v1104_v4 }
 0x8c4   :  { %v1119_v5 = vmul.f32 %v1117_v3, %v1103_v2 }
 0x8c6   :  { %2707 = vmatprep.mubr.msk.f32.mxu0 %vm1136_vm4, %v1119_v5 }
 0x8c7   :  { %2708 = vmatmul.mubr.msk.f32.vlgmr.msra.gmra.mxu0 %vm1136_vm4, %v1120_v6 }
 0x8c8   :  { %2733 = vmatprep.mubr.msk.f32.mxu0 %vm2896_vm1, %v2895_v34 }
 0x987   :  { %v2709_v8 = vpop.f32.mrf.mxu0 }
 0x988   :  { %v1215_v9 = vadd.f32 %v2709_v8, %v2469_v7 }
 0x989   :  { %v1209_v10 = vpop.f32.mrf.mxu0 }
 0x98a   :  { %v1210_v11 = vadd.f32 %v2469_v7, %v1209_v10  ;;  %v1219_v12 = vadd.f32 %v1215_v9, %v1010_v37 }
 0x98c   :  { %v1225_v13 = vsel %vm58_vm0, %v1219_v12, 0.0  ;;  %v1218_v14 = vadd.f32 %v1210_v11, %v3156_v35 }
 0x98d   :  { %1226 = vadd.xlane.f32.xlu1 %v1225_v13 }
 0x98e   :  { %v1222_v15 = vsel %vm58_vm0, %v1218_v14, 0.0 }
 0x98f   :  { %1223 = vadd.xlane.f32.xlu0 %v1222_v15 }
 0xa16   :  { %v1227_v33 = vpop.xlane.xlu1 %1226 }
 0xa17   :  { %v1229_v31 = vmul.f32 0.03125, %v1227_v33 }
 0xa18   :  { %v1224_v16 = vpop.xlane.xlu0 %1223 }
 0xa19   :  { %v1231_v17 = vsub.f32 %v1219_v12, %v1229_v31  ;;  %v1228_v18 = vmul.f32 0.03125, %v1224_v16 }
 0xa1b   :  { %v1230_v19 = vsub.f32 %v1218_v14, %v1228_v18  ;;  %v1233_v20 = vmul.f32 %v1231_v17, %v1231_v17 }
 0xa1d   :  { %v1237_v21 = vsel %vm58_vm0, %v1233_v20, 0.0  ;;  %v1232_v22 = vmul.f32 %v1230_v19, %v1230_v19 }
 0xa1e   :  { %1238 = vadd.xlane.f32.xlu1 %v1237_v21 }
 0xa1f   :  { %v1234_v23 = vsel %vm58_vm0, %v1232_v22, 0.0 }
 0xa20   :  { %1235 = vadd.xlane.f32.xlu0 %v1234_v23 }
 0xaa7   :  { %v1239_v28 = vpop.xlane.xlu1 %1238 }
 0xaa8   :  { %v1241_v29 = vmul.f32 0.03125, %v1239_v28 }
 0xaa9   :  { %v1236_v30 = vpop.xlane.xlu0 %1235 }
 0xaaa   :  { %v1243_v32 = vadd.f32 1e-12, %v1241_v29  ;;  %v1240_v35 = vmul.f32 0.03125, %v1236_v30 }
 0xaac   :  { %2841 = vrsqrt.f32 %v1243_v32  ;;  %v1242_v36 = vadd.f32 1e-12, %v1240_v35 }
 0xaae   :  { %2843 = vrsqrt.f32 %v1242_v36 }
 0xab9   :  { %v2842_v37 = vpop.eup %2841 }
 0xaba   :  { %v1247_v39 = vmul.f32 %v2842_v37, %v1231_v17 }
 0xabb   :  { %v2844_v40 = vpop.eup %2843 }
 0xabc   :  { %v1246_v41 = vmul.f32 %v2844_v40, %v1230_v19  ;;  %v1255_v42 = vmul.f32 %v2472_v38, %v1247_v39 }
 0xabe   :  { %v1254_v44 = vmul.f32 %v2472_v38, %v1246_v41  ;;  %v3222_v46 = vadd.f32 %v2473_v43, %v1255_v42 }
 0xac0   :  { %v3220_v45 = vadd.f32 %v2473_v43, %v1254_v44 }
 0xac2   :  { %2718 = vmatprep.mubr.msk.f32.mxu1 %vm58_vm0, %v3220_v45 }
 0xac3   :  { %2719 = vmatmul.mubr.msk.f32.vlgmr.msra.gmra.mxu1 %vm58_vm0, %v3222_v46 }
 0xac4   :  { %2723 = vmatprep.mubr.msk.f32.mxu1 %vm2896_vm1, %v2895_v34 }
 0xb83   :  { %v2720_v47 = vpop.f32.mrf.mxu1 }
 0xb84   :  { %v3239_v52 = vadd.f32 %v2720_v47, %v2479_v48 }
 0xb85   :  { %v1349_v49 = vpop.f32.mrf.mxu1 }
 0xb86   :  { %v3233_v51 = vadd.f32 %v2479_v48, %v1349_v49  ;;  %v2497_v49 = vld [vmem:[%s3405_s6 + $0x38] sm:$0xff] }
 0xb88   :  { %1524 = vrot.lane.b32.xlu1 %v3233_v51, %s2897_s23  ;;  %1359 = vrot.lane.b32.xlu0 %v3233_v51, %s2898_s24 }
 0xb8c   :  { %1522 = vrot.lane.b32.xlu1 %v3233_v51, %s2899_s25  ;;  %1858 = vrot.lane.b32.xlu0 %v3239_v52, %s2897_s23 }
 0xb90   :  { %1693 = vrot.lane.b32.xlu1 %v3239_v52, %s2898_s24 }
 0xb94   :  { %1856 = vrot.lane.b32.xlu1 %v3239_v52, %s2899_s25 }
 0xbfa   :  { %v1525_v53 = vpop.permute.xlu1 %1524  ;;  %v1360_v54 = vpop.permute.xlu0 %1359 }
 0xbfb   :  { %2722 = vmatpush3.xpose.msk.msra.mxu1 %vm202_vm2, %v1360_v54  ;;  %2732 = vmatpush3.xpose.msk.msra.mxu0 %vm202_vm2, %v1525_v53 }
 0xbfc   :  { %2741 = vmatprep.subr.mxu0 %v2895_v34  ;;  %2726 = vmatprep.subr.mxu1 %v2895_v34 }
 0xbfe   :  { %v1523_v55 = vpop.permute.xlu1 %1522  ;;  %2724 = vmatmul.mubr.msk.f32.vlgmr.msra.gmra.mxu1 %vm202_vm2, %v3233_v51  ;;  %v1859_v57 = vpop.permute.xlu0 %1858 }
 0xbff   :  { %2734 = vmatmul.mubr.msk.f32.vlgmr.msra.gmra.mxu0 %vm202_vm2, %v1523_v55  ;;  %2728 = vmatprep.mubr.msk.f32.mxu1 %vm2896_vm1, %v2895_v34 }
 0xc00   :  { %2743 = vmatprep.mubr.msk.f32.mxu0 %vm2896_vm1, %v2895_v34 }
 0xc02   :  { %v1694_v56 = vpop.permute.xlu1 %1693 }
 0xc03   :  { %2742 = vmatpush3.xpose.msk.msra.mxu0 %vm202_vm2, %v1694_v56 }
 0xc04   :  { %2751 = vmatprep.subr.mxu0 %v2895_v34 }
 0xc06   :  { %2744 = vmatmul.mubr.msk.f32.vlgmr.msra.gmra.mxu0 %vm202_vm2, %v3239_v52  ;;  %v1857_v58 = vpop.permute.xlu1 %1856 }
 0xc07   :  { %2752 = vmatpush3.xpose.msk.msra.mxu0 %vm202_vm2, %v1859_v57  ;;  %2753 = vmatprep.mubr.msk.f32.mxu0 %vm2896_vm1, %v2895_v34 }
 0xc08   :  { %2761 = vmatprep.subr.mxu0 %v2497_v49 }
 0xc0a   :  { %2754 = vmatmul.mubr.msk.f32.vlgmr.msra.gmra.mxu0 %vm202_vm2, %v1857_v58 }
 0xc0b   :  { %2762 = vmatpush3.msra.mxu0 %v2497_v49 }
 0xcbe   :  { %v1431_v59 = vpop.f32.mrf.mxu1 }
 0xcbf   :  { %v1432_v61 = vadd.f32 %v1431_v59, %v3074_v50  ;;  %v1596_v62 = vpop.f32.mrf.mxu0 }
 0xcc0   :  { %v1597_v63 = vadd.f32 %v1596_v62, %v3074_v50  ;;  %v2725_v0 = vpop.f32.mrf.mxu1 }
 0xcc1   :  { %v2735_v1 = vpop.f32.mrf.mxu0  ;;  %v1435_v2 = vsel %vm277_vm3, %v1432_v61, -inf }
 0xcc2   :  { %1436 = vmax.xlane.f32.xlu0 %v1435_v2  ;;  %v1600_v3 = vsel %vm277_vm3, %v1597_v63, -inf  ;;  %v2499_v2 = vld [vmem:[%s3406_s7 + $0x1] ss:$0 sm:$0xff] }
 0xcc3   :  { %1601 = vmax.xlane.f32.xlu1 %v1600_v3 }
 0xcc6   :  { %v1765_v4 = vpop.f32.mrf.mxu0 }
 0xcc7   :  { %v1766_v5 = vadd.f32 %v1765_v4, %v3080_v60 }
 0xcc8   :  { %v2745_v6 = vpop.f32.mrf.mxu0 }
 0xcc9   :  { %v1769_v7 = vsel %vm277_vm3, %v1766_v5, -inf }
 0xcca   :  { %1770 = vmax.xlane.f32.xlu0 %v1769_v7  ;;  %v1930_v8 = vpop.f32.mrf.mxu0 }
 0xccb   :  { %v1931_v9 = vadd.f32 %v1930_v8, %v3080_v60 }
 0xccc   :  { %v2755_v10 = vpop.f32.mrf.mxu0 }
 0xccd   :  { %v1934_v50 = vsel %vm277_vm3, %v1931_v9, -inf }
 0xcce   :  { %1935 = vmax.xlane.f32.xlu0 %v1934_v50 }
 0xd4b   :  { %v1437_v11 = vpop.xlane.xlu0 %1436 }
 0xd4c   :  { %v1438_v12 = vsub.f32 %v1432_v61, %v1437_v11  ;;  %v1602_v13 = vpop.xlane.xlu1 %1601 }
 0xd4d   :  { %v1603_v14 = vsub.f32 %v1597_v63, %v1602_v13 }
 0xd4e   :  { %v1439_v15 = vmul.f32 1.442695, %v1438_v12 }
 0xd4f   :  { %v1604_v33 = vmul.f32 1.442695, %v1603_v14 }
 0xd50   :  { %2845 = vpow2.f32 %v1439_v15 }
 0xd51   :  { %2847 = vpow2.f32 %v1604_v33 }
 0xd53   :  { %v1771_v31 = vpop.xlane.xlu0 %1770 }
 0xd54   :  { %v1772_v16 = vsub.f32 %v1766_v5, %v1771_v31 }
 0xd56   :  { %v1773_v17 = vmul.f32 1.442695, %v1772_v16 }
 0xd57   :  { %v1936_v23 = vpop.xlane.xlu0 %1935 }
 0xd58   :  { %2849 = vpow2.f32 %v1773_v17  ;;  %v1937_v24 = vsub.f32 %v1931_v9, %v1936_v23  ;;  %v2508_v17 = vld [vmem:[%s3409_s10 + $0x30] sm:$0xff] }
 0xd5a   :  { %v1938_v25 = vmul.f32 1.442695, %v1937_v24 }
 0xd5c   :  { %2851 = vpow2.f32 %v1938_v25 }
 0xd5d   :  { %v2846_v18 = vpop.eup %2845 }
 0xd5e   :  { %v2848_v19 = vpop.eup %2847  ;;  %v1441_v60 = vsel %vm277_vm3, %v2846_v18, 0.0 }
 0xd5f   :  { %1442 = vadd.xlane.f32.xlu0 %v1441_v60  ;;  %v1606_v20 = vsel %vm277_vm3, %v2848_v19, 0.0 }
 0xd60   :  { %1607 = vadd.xlane.f32.xlu1 %v1606_v20 }
 0xd65   :  { %v2850_v21 = vpop.eup %2849 }
 0xd66   :  { %v1775_v22 = vsel %vm277_vm3, %v2850_v21, 0.0 }
 0xd67   :  { %1776 = vadd.xlane.f32.xlu0 %v1775_v22 }
 0xd69   :  { %v2852_v26 = vpop.eup %2851 }
 0xd6a   :  { %v1940_v27 = vsel %vm277_vm3, %v2852_v26, 0.0 }
 0xd71   :  { %1611 = vrot.lane.b32.xlu1 %v3233_v51, %s2900_s1 }
 0xd75   :  { %1780 = vrot.lane.b32.xlu1 %v3239_v52, %s2901_s28 }
 0xd7d   :  { %1446 = vrot.lane.b32.xlu0 %v3233_v51, %s2901_s28  ;;  %v2496_v51 = vld [vmem:[%s3405_s6 + $0x30] sm:$0xff] }
 0xd7e   :  { %2763 = vmatprep.subr.mxu0 %v2496_v51 }
 0xd7f   :  { %2764 = vmatpush3.msra.mxu0 %v2496_v51 }
 0xd99   :  { %1941 = vadd.xlane.f32.xlu1 %v1940_v27 }
 0xdaa   :  { %1945 = vrot.lane.b32.xlu1 %v3239_v52, %s2900_s1  ;;  %v2494_v52 = vld [vmem:[%s3405_s6 + $0x20] sm:$0xff] }
 0xde8   :  { %v1443_v28 = vpop.xlane.xlu0 %1442 }
 0xde9   :  { %2853 = vrcp.f32 %v1443_v28  ;;  %v1608_v29 = vpop.xlane.xlu1 %1607  ;;  %v2505_v28 = vld [vmem:[%s3408_s9 + $0x1] ss:$0 sm:$0xff] }
 0xdea   :  { %2855 = vrcp.f32 %v1608_v29 }
 0xded   :  { %v1612_v36 = vpop.permute.xlu1 %1611 }
 0xdf0   :  { %v1777_v30 = vpop.xlane.xlu0 %1776 }
 0xdf1   :  { %2857 = vrcp.f32 %v1777_v30  ;;  %v1781_v40 = vpop.permute.xlu1 %1780 }
 0xdf4   :  { %v1447_v32 = vpop.permute.xlu0 %1446 }
 0xdf5   :  { %2727 = vmatpush3.msra.mxu1 %v1447_v32 }
 0xdf6   :  { %v2854_v35 = vpop.eup %2853  ;;  %2736 = vmatprep.subr.mxu1 %v2895_v34 }
 0xdf7   :  { %v1445_v37 = vmul.f32 %v2854_v35, %v2846_v18  ;;  %v2856_v38 = vpop.eup %2855  ;;  %v2507_v18 = vld [vmem:[%s3409_s10 + $0x28] sm:$0xff] }
 0xdf8   :  { %v1610_v39 = vmul.f32 %v2856_v38, %v2848_v19  ;;  %v2506_v19 = vld [vmem:[%s3409_s10 + $0x20] sm:$0xff]  ;;  %v2521_v38 = vld [vmem:[%s3411_s12 + $0x78] sm:$0xff] }
 0xdf9   :  { %2729 = vmatmul.mubr.msk.f32.vlgmr.msra.gmra.mxu1 %vm277_vm3, %v1445_v37 }
 0xdfa   :  { %2737 = vmatpush3.msra.mxu1 %v1612_v36  ;;  %2738 = vmatprep.mubr.msk.f32.mxu1 %vm2896_vm1, %v2895_v34 }
 0xdfb   :  { %2746 = vmatprep.subr.mxu1 %v2895_v34 }
 0xdfd   :  { %2739 = vmatmul.mubr.msk.f32.vlgmr.msra.gmra.mxu1 %vm277_vm3, %v1610_v39  ;;  %v2520_v39 = vld [vmem:[%s3411_s12 + $0x70] sm:$0xff] }
 0xdfe   :  { %v2858_v41 = vpop.eup %2857  ;;  %2747 = vmatpush3.msra.mxu1 %v1781_v40  ;;  %2748 = vmatprep.mubr.msk.f32.mxu1 %vm2896_vm1, %v2895_v34  ;;  %v2519_v40 = vld [vmem:[%s3411_s12 + $0x68] sm:$0xff] }
 0xdff   :  { %v1779_v42 = vmul.f32 %v2858_v41, %v2850_v21  ;;  %2756 = vmatprep.subr.mxu1 %v2895_v34  ;;  %v2518_v41 = vld [vmem:[%s3411_s12 + $0x60] sm:$0xff] }
 0xe01   :  { %2749 = vmatmul.mubr.msk.f32.vlgmr.msra.gmra.mxu1 %vm277_vm3, %v1779_v42  ;;  %v2517_v42 = vld [vmem:[%s3411_s12 + $0x58] sm:$0xff] }
 0xe02   :  { %2758 = vmatprep.mubr.msk.f32.mxu1 %vm2896_vm1, %v2895_v34  ;;  %v2495_v34 = vld [vmem:[%s3405_s6 + $0x28] sm:$0xff] }
 0xe03   :  { %2765 = vmatprep.subr.mxu0 %v2495_v34 }
 0xe04   :  { %2766 = vmatpush3.msra.mxu0 %v2495_v34 }
 0xe05   :  { %2767 = vmatprep.subr.mxu0 %v2494_v52 }
 0xe06   :  { %2768 = vmatpush3.msra.mxu0 %v2494_v52 }
 0xe07   :  { %2783 = vmatprep.subr.mxu0 %v2521_v38 }
 0xe22   :  { %v1942_v43 = vpop.xlane.xlu1 %1941 }
 0xe23   :  { %2859 = vrcp.f32 %v1942_v43  ;;  %v2516_v43 = vld [vmem:[%s3411_s12 + $0x50] sm:$0xff] }
 0xe26   :  { %v1946_v44 = vpop.permute.xlu1 %1945 }
 0xe27   :  { %2757 = vmatpush3.msra.mxu1 %v1946_v44  ;;  %v2515_v44 = vld [vmem:[%s3411_s12 + $0x48] sm:$0xff] }
 0xe30   :  { %v2860_v47 = vpop.eup %2859 }
 0xe31   :  { %v1944_v48 = vmul.f32 %v2860_v47, %v2852_v26  ;;  %v2504_v26 = vld [vmem:[%s3407_s8 + $0x1] ss:$0 sm:$0xff] }
 0xe32   :  { %v2514_v47 = vld [vmem:[%s3411_s12 + $0x40] sm:$0xff] }
 0xe33   :  { %2759 = vmatmul.mubr.msk.f32.vlgmr.msra.gmra.mxu1 %vm277_vm3, %v1944_v48  ;;  %v2511_v48 = vld [vmem:[%s3410_s11 + $0x1] ss:$0 sm:$0xff] }
 0xeb9   :  { %v1518_v53 = vpop.f32.mrf.mxu1 }
 0xebb   :  { %v2730_v54 = vpop.f32.mrf.mxu1 }
 0xebd   :  { %v1683_v55 = vpop.f32.mrf.mxu1 }
 0xebe   :  { %1688 = vrot.lane.b32.xlu0 %v1683_v55, %s2902_s22 }
 0xebf   :  { %v2740_v56 = vpop.f32.mrf.mxu1 }
 0xec1   :  { %v1852_v57 = vpop.f32.mrf.mxu1 }
 0xec3   :  { %v2750_v58 = vpop.f32.mrf.mxu1 }
 0xef3   :  { %v2017_v59 = vpop.f32.mrf.mxu1 }
 0xef4   :  { %2022 = vrot.lane.b32.xlu1 %v2017_v59, %s2902_s22 }
 0xef5   :  { %v2760_v61 = vpop.f32.mrf.mxu1 }
 0xf30   :  { %v1689_v62 = vpop.permute.xlu0 %1688 }
 0xf31   :  { %v1691_v63 = vsel %vm202_vm2, %v1518_v53, %v1689_v62 }
 0xf32   :  { %2769 = vmatprep.mubr.msk.f32.mxu0 %vm58_vm0, %v1691_v63 }
 0xf66   :  { %v2023_v0 = vpop.permute.xlu1 %2022 }
 0xf67   :  { %v2025_v1 = vsel %vm202_vm2, %v1852_v57, %v2023_v0 }
 0xf68   :  { %2770 = vmatmul.mubr.msk.f32.vlgmr.msra.gmra.mxu0 %vm58_vm0, %v2025_v1 }
 0xf69   :  { %2784 = vmatpush3.msra.mxu0 %v2521_v38 }
 0xf6a   :  { %2785 = vmatprep.subr.mxu0 %v2520_v39 }
 0xf6b   :  { %2786 = vmatpush3.msra.mxu0 %v2520_v39 }
 0xf6c   :  { %2787 = vmatprep.subr.mxu0 %v2519_v40 }
 0xf6d   :  { %2788 = vmatpush3.msra.mxu0 %v2519_v40 }
 0xf6e   :  { %2789 = vmatprep.subr.mxu0 %v2518_v41 }
 0xf6f   :  { %2790 = vmatpush3.msra.mxu0 %v2518_v41 }
 0xf70   :  { %2791 = vmatprep.subr.mxu0 %v2517_v42 }
 0xf71   :  { %2792 = vmatpush3.msra.mxu0 %v2517_v42 }
 0xf72   :  { %2793 = vmatprep.subr.mxu0 %v2516_v43 }
 0xf73   :  { %2794 = vmatpush3.msra.mxu0 %v2516_v43 }
 0xf74   :  { %2795 = vmatprep.subr.mxu0 %v2515_v44 }
 0xf75   :  { %2796 = vmatpush3.msra.mxu0 %v2515_v44 }
 0xf76   :  { %2797 = vmatprep.subr.mxu0 %v2514_v47 }
 0xf77   :  { %2798 = vmatpush3.msra.mxu0 %v2514_v47 }
0x1028   :  { %v2771_v3 = vpop.f32.mrf.mxu0 }
0x1029   :  { %v2117_v4 = vadd.f32 %v2771_v3, %v2499_v2 }
0x102a   :  { %v2111_v5 = vpop.f32.mrf.mxu0 }
0x102b   :  { %v2112_v6 = vadd.f32 %v2499_v2, %v2111_v5  ;;  %v2121_v7 = vadd.f32 %v2117_v4, %v3222_v46 }
0x102d   :  { %v2129_v8 = vsel %vm58_vm0, %v2121_v7, 0.0  ;;  %v2120_v9 = vadd.f32 %v2112_v6, %v3220_v45  ;;  %v2509_v45 = vld [vmem:[%s3409_s10 + $0x38] sm:$0xff] }
0x102e   :  { %2130 = vadd.xlane.f32.xlu1 %v2129_v8  ;;  %2772 = vmatprep.subr.mxu1 %v2509_v45  ;;  %v2523_v8 = vld [vmem:[%s3412_s13 + $0x1] ss:$0 sm:$0xff] }
0x102f   :  { %v2126_v10 = vsel %vm58_vm0, %v2120_v9, 0.0  ;;  %2773 = vmatpush3.msra.mxu1 %v2509_v45 }
0x1030   :  { %2127 = vadd.xlane.f32.xlu0 %v2126_v10  ;;  %2774 = vmatprep.subr.mxu1 %v2508_v17 }
0x1031   :  { %2775 = vmatpush3.msra.mxu1 %v2508_v17 }
0x1032   :  { %2776 = vmatprep.subr.mxu1 %v2507_v18 }
0x1033   :  { %2777 = vmatpush3.msra.mxu1 %v2507_v18 }
0x1034   :  { %2778 = vmatprep.subr.mxu1 %v2506_v19 }
0x1035   :  { %2779 = vmatpush3.msra.mxu1 %v2506_v19 }
0x10b7   :  { %v2131_v50 = vpop.xlane.xlu1 %2130 }
0x10b8   :  { %v2133_v11 = vmul.f32 0.03125, %v2131_v50 }
0x10b9   :  { %v2128_v12 = vpop.xlane.xlu0 %2127 }
0x10ba   :  { %v2132_v13 = vmul.f32 0.03125, %v2128_v12  ;;  %v2135_v14 = vsub.f32 %v2121_v7, %v2133_v11 }
0x10bc   :  { %v2134_v15 = vsub.f32 %v2120_v9, %v2132_v13  ;;  %v2137_v16 = vmul.f32 %v2135_v14, %v2135_v14 }
0x10be   :  { %v2136_v33 = vmul.f32 %v2134_v15, %v2134_v15  ;;  %v2141_v46 = vsel %vm58_vm0, %v2137_v16, 0.0 }
0x10c0   :  { %v2138_v31 = vsel %vm58_vm0, %v2136_v33, 0.0 }
0x10c1   :  { %2139 = vadd.xlane.f32.xlu0 %v2138_v31 }
0x10c5   :  { %2142 = vadd.xlane.f32.xlu0 %v2141_v46 }
0x114a   :  { %v2140_v60 = vpop.xlane.xlu0 %2139 }
0x114b   :  { %v2144_v20 = vmul.f32 0.03125, %v2140_v60 }
0x114d   :  { %v2146_v21 = vadd.f32 1e-12, %v2144_v20 }
0x114e   :  { %v2143_v22 = vpop.xlane.xlu0 %2142 }
0x114f   :  { %2861 = vrsqrt.f32 %v2146_v21  ;;  %v2145_v23 = vmul.f32 0.03125, %v2143_v22 }
0x1151   :  { %v2147_v24 = vadd.f32 1e-12, %v2145_v23 }
0x1153   :  { %2863 = vrsqrt.f32 %v2147_v24 }
0x115c   :  { %v2862_v25 = vpop.eup %2861 }
0x115d   :  { %v2150_v27 = vmul.f32 %v2862_v25, %v2134_v15 }
0x115f   :  { %v2158_v29 = vmul.f32 %v2504_v26, %v2150_v27 }
0x1160   :  { %v2864_v30 = vpop.eup %2863 }
0x1161   :  { %v2151_v32 = vmul.f32 %v2864_v30, %v2135_v14  ;;  %v3346_v35 = vadd.f32 %v2505_v28, %v2158_v29 }
0x1163   :  { %v2159_v36 = vmul.f32 %v2504_v26, %v2151_v32  ;;  %2780 = vmatprep.mubr.msk.f32.mxu1 %vm58_vm0, %v3346_v35  ;;  %v2529_v32 = vld [vmem:[%s3414_s15 + $0x1] ss:$0 sm:$0xff] }
0x1165   :  { %v2167_v37 = vadd.f32 %v2505_v28, %v2159_v36  ;;  %v2528_v28 = vld [vmem:[%s3413_s14 + $0x1] ss:$0 sm:$0xff] }
0x1167   :  { %2781 = vmatmul.mubr.msk.f32.vlgmr.msra.gmra.mxu1 %vm58_vm0, %v2167_v37 }
0x1227   :  { %v2782_v49 = vpop.f32.mrf.mxu1 }
0x1228   :  { %v2259_v51 = vadd.f32 %v2782_v49, %v2511_v48 }
0x1229   :  { %v2253_v34 = vpop.f32.mrf.mxu1 }
0x122a   :  { %v2265_v52 = vmul.f32 0.044715, %v2259_v51  ;;  %v2254_v53 = vadd.f32 %v2511_v48, %v2253_v34  ;;  %v2263_v5 = vmul.f32 0.5, %v2259_v51 }
0x122c   :  { %v2267_v54 = vmul.f32 %v2265_v52, %v2259_v51  ;;  %v2264_v55 = vmul.f32 0.044715, %v2254_v53  ;;  %v2262_v3 = vmul.f32 0.5, %v2254_v53 }
0x122e   :  { %v2269_v56 = vmul.f32 %v2267_v54, %v2259_v51  ;;  %v2266_v57 = vmul.f32 %v2264_v55, %v2254_v53 }
0x1230   :  { %v2271_v58 = vadd.f32 %v2269_v56, %v2259_v51  ;;  %v2268_v59 = vmul.f32 %v2266_v57, %v2254_v53 }
0x1232   :  { %v2273_v61 = vmul.f32 0.7978846, %v2271_v58  ;;  %v2270_v62 = vadd.f32 %v2268_v59, %v2254_v53 }
0x1234   :  { %2865 = vtanh.f32 %v2273_v61  ;;  %v2272_v63 = vmul.f32 0.7978846, %v2270_v62 }
0x1236   :  { %2867 = vtanh.f32 %v2272_v63 }
0x1241   :  { %v2866_v0 = vpop.eup %2865 }
0x1242   :  { %v2277_v2 = vadd.f32 1.0, %v2866_v0 }
0x1243   :  { %v2868_v1 = vpop.eup %2867 }
0x1244   :  { %v2276_v4 = vadd.f32 1.0, %v2868_v1  ;;  %v2279_v7 = vmul.f32 %v2277_v2, %v2263_v5 }
0x1246   :  { %v2278_v6 = vmul.f32 %v2276_v4, %v2262_v3 }
0x1248   :  { %2799 = vmatprep.mubr.msk.f32.mxu0 %vm1136_vm4, %v2278_v6 }
0x1249   :  { %2800 = vmatmul.mubr.msk.f32.vlgmr.msra.gmra.mxu0 %vm1136_vm4, %v2279_v7 }
0x1309   :  { %v2801_v9 = vpop.f32.mrf.mxu0 }
0x130a   :  { %v2375_v10 = vadd.f32 %v2801_v9, %v2523_v8 }
0x130b   :  { %v2369_v50 = vpop.f32.mrf.mxu0 }
0x130c   :  { %v2370_v11 = vadd.f32 %v2523_v8, %v2369_v50  ;;  %v2379_v12 = vadd.f32 %v2375_v10, %v2167_v37 }
0x130e   :  { %v2387_v13 = vsel %vm58_vm0, %v2379_v12, 0.0  ;;  %v2378_v14 = vadd.f32 %v2370_v11, %v3346_v35 }
0x130f   :  { %2388 = vadd.xlane.f32.xlu1 %v2387_v13 }
0x1310   :  { %v2384_v15 = vsel %vm58_vm0, %v2378_v14, 0.0 }
0x1311   :  { %2385 = vadd.xlane.f32.xlu0 %v2384_v15 }
0x1398   :  { %v2389_v33 = vpop.xlane.xlu1 %2388 }
0x1399   :  { %v2391_v31 = vmul.f32 0.03125, %v2389_v33 }
0x139a   :  { %v2386_v16 = vpop.xlane.xlu0 %2385 }
0x139b   :  { %v2393_v46 = vsub.f32 %v2379_v12, %v2391_v31  ;;  %v2390_v45 = vmul.f32 0.03125, %v2386_v16 }
0x139d   :  { %v2392_v17 = vsub.f32 %v2378_v14, %v2390_v45  ;;  %v2395_v18 = vmul.f32 %v2393_v46, %v2393_v46 }
0x139f   :  { %v2399_v19 = vsel %vm58_vm0, %v2395_v18, 0.0  ;;  %v2394_v60 = vmul.f32 %v2392_v17, %v2392_v17 }
0x13a0   :  { %2400 = vadd.xlane.f32.xlu1 %v2399_v19 }
0x13a1   :  { %v2396_v20 = vsel %vm58_vm0, %v2394_v60, 0.0 }
0x13a2   :  { %2397 = vadd.xlane.f32.xlu0 %v2396_v20 }
0x1429   :  { %v2401_v21 = vpop.xlane.xlu1 %2400 }
0x142a   :  { %v2403_v22 = vmul.f32 0.03125, %v2401_v21 }
0x142b   :  { %v2398_v23 = vpop.xlane.xlu0 %2397 }
0x142c   :  { %v2405_v24 = vadd.f32 1e-12, %v2403_v22  ;;  %v2402_v25 = vmul.f32 0.03125, %v2398_v23 }
0x142e   :  { %2869 = vrsqrt.f32 %v2405_v24  ;;  %v2404_v26 = vadd.f32 1e-12, %v2402_v25 }
0x1430   :  { %2871 = vrsqrt.f32 %v2404_v26 }
0x143b   :  { %v2870_v27 = vpop.eup %2869 }
0x143c   :  { %v2409_v29 = vmul.f32 %v2870_v27, %v2393_v46 }
0x143d   :  { %v2872_v30 = vpop.eup %2871 }
0x143e   :  { %v2408_v35 = vmul.f32 %v2872_v30, %v2392_v17  ;;  %v2417_v36 = vmul.f32 %v2528_v28, %v2409_v29 }
0x1440   :  { %v2416_v37 = vmul.f32 %v2528_v28, %v2408_v35  ;;  %v2425_v38 = vadd.f32 %v2529_v32, %v2417_v36 }
0x1442   :  { %v2424_v39 = vadd.f32 %v2529_v32, %v2416_v37  ;;  %2427 = vst.msk [vmem:[#allocation2 + $0x8] sm:$0xff] %vm58_vm0, %v2425_v38 }
0x1444   :  { %2426 = vst.msk [vmem:[#allocation2] sm:$0xff] %vm58_vm0, %v2424_v39 }
0x1445   :  { %2884 = shalt.err (!%p2881_p4)
}
0x1446   :  { %s2904_s14 = smov 128   ;;  %s2905_s15 = smov 8  }
0x1447   :  { %2439 = dma.vmem_to_hbm [thread:$0]  %s2434_s18, 256, %s3415_s16, [#allocation3], %s2904_s14, %s2904_s14, %s2905_s15  }
0x1448   :  { %2893 = dma.done.wait [#allocation3], 256  }
0x1449   :  { %2894 = vsyncadd [#allocation3], 4294967040 }
0x144a   :  { %2443 = vsyncpa [#allocation3], 1 }

</bundles_post_ra>
